<compile_context>
chip_gen: v6e
topology: v6e:2x2x1
jax: 0.10.0
libtpu: 0.0.40
codegen_flags: <defaults>
</compile_context>

<pallas_src>
import functools

import jax
import jax.numpy as jnp
from jax.experimental import pallas as pl
from jax.experimental.pallas import tpu as pltpu

EPS = 1e-5  # PyTorch InstanceNorm2d default eps


def _tpu_vmem_bytes():
    try:
        v = int(pltpu.get_tpu_info().vmem_capacity_bytes)
        return min(max(v, 64 << 20), 128 << 20)
    except Exception:
        return 64 << 20  # conservative (v7x-sized) fallback


_VMEM_BYTES = _tpu_vmem_bytes()
# per-kernel working-set target and the scoped-VMEM request, derived from the chip generation
VMEM_BUDGET = _VMEM_BYTES // 3                      # ~42 MiB on v5e/v6e, ~21 MiB on v7x
VMEM_LIMIT = max(min((_VMEM_BYTES * 3) // 4, _VMEM_BYTES - (8 << 20)),
                 VMEM_BUDGET + (8 << 20))           # ~96 MiB on v5e/v6e, ~48 MiB on v7x


def _pick_tiling(p, c_in, c_out, ks, ksi, nn, a):
    """Largest point tile fitting the VMEM budget; P is padded UP to the tile afterwards."""
    p128 = ((p + 127) // 128) * 128
    tile = 128
    w_res = 8 * (c_out * ks * c_in + c_out * ksi * c_out + c_out * c_in + c_out)  # resident W
    for cand in (1024, 512, 256, 128):
        if cand > p128:
            continue
        # kernel 1: 2x(g + w) blocks + kf scratch + 2x z out (+ tiny stats)
        k1 = 4 * cand * (2 * nn * (c_in + ks) + ks * c_in + 2 * c_out)
        # kernel 2: 2x(z_in + xs) + f1 scratch + 2x zi out
        k2 = 4 * cand * a * (2 * c_out + 2 * c_in + 2 * c_out + c_out)
        # kernel 3: 2x(zi + xs) + 2x out
        k3 = 4 * cand * a * (2 * c_out + 2 * c_in + 2 * c_out)
        if w_res + max(k1, k2, k3) <= VMEM_BUDGET:
            tile = cand
            break
    p_pad = -(-p // tile) * tile
    return tile, p_pad


def _inter_kernel(g_ref, w_ref, wt_ref, z_ref, st_ref, kf_ref, *, ks, nn, c_in):
    # g_ref : (NN, Cin, Pt)  gathered (shadow-padded) neighbor features, 0 in point padding
    # w_ref : (NN, KS, Pt)   inter_w kernel-point weights (NN leading -> contiguous loads)
    # wt_ref: (Cout, KS*Cin) W_inter with k-major columns (resident)
    # z_ref : (Cout, Pt)     pre-norm inter conv output for this (b, a, tile)
    # st_ref: (Cout, 2)      running [sum, sum_sq] for this (b, a), accumulated over tiles
    # kf_ref: (KS*Cin, Pt)   VMEM staging for one fused fat-K MXU matmul
    for k in range(ks):
        acc = g_ref[0] * w_ref[0, k:k + 1, :]
        for n in range(1, nn):
            acc = acc + g_ref[n] * w_ref[n, k:k + 1, :]
        kf_ref[k * c_in:(k + 1) * c_in, :] = acc
    z = jnp.dot(wt_ref[...], kf_ref[...], preferred_element_type=jnp.float32)
    z_ref[...] = z

    # InstanceNorm pass 1: per-(b, a) partial stats; point axis is the "arbitrary" grid axis.
    @pl.when(pl.program_id(2) == 0)
    def _init():
        st_ref[...] = jnp.zeros_like(st_ref)

    st_ref[...] += jnp.concatenate(
        [jnp.sum(z, axis=1, keepdims=True), jnp.sum(z * z, axis=1, keepdims=True)], axis=1)


def _intra_kernel(idx_ref, z_ref, ssn_ref, xs_ref, wi_ref, wsk_ref, bsk_ref,
                  zi_ref, sti_ref, sts_ref, f1_ref,
                  *, ksi, n_anchor, n_valid, p_tile, c_out):
    # idx_ref : SMEM (A, KSI)    anchor-graph indices (scalar-prefetched)
    # z_ref   : (A, Cout, Pt)    pre-norm inter output
    # ssn_ref : (Cout, 2)        inter (scale, shift) = (istd, -mean*istd)
    # xs_ref  : (A, Cin, Pt)     skip (input) features
    # wi_ref  : (Cout, KSI*Cout) W_intra, k-major columns; wsk_ref:(Cout,Cin); bsk_ref:(Cout,1)
    # zi_ref  : (A, Cout, Pt)    pre-norm intra output
    # sti/sts : (Cout, 2)        per-(b, tile) partial [sum, sum_sq] (no cross-step accum)
    # f1_ref  : (A, Cout, Pt)    scratch: normalized + relu'd inter features
    t = pl.program_id(1)
    col = jax.lax.broadcasted_iota(jnp.int32, (1, p_tile), 1) + t * p_tile
    maskf = (col < n_valid).astype(jnp.float32)            # zero out padded point columns

    sc = ssn_ref[:, 0:1]
    sh = ssn_ref[:, 1:2]

    # inter InstanceNorm pass 2 + relu into VMEM scratch (no HBM round trip for f1)
    def norm_body(a, carry):
        f1_ref[a] = jnp.maximum(z_ref[a] * sc + sh, 0.0) * maskf
        return carry

    jax.lax.fori_loop(0, n_anchor, norm_body, 0)

    wks = [wi_ref[:, k * c_out:(k + 1) * c_out] for k in range(ksi)]   # hoisted weight slices
    wsk = wsk_ref[...]
    bsk = bsk_ref[...]

    def conv_body(a, carry):
        sum_i, ss_i, sum_s, ss_s = carry
        # intra SO3 conv: KSI accumulating dots straight off f1 (no staging copies)
        zi = jnp.dot(wks[0], f1_ref[idx_ref[a, 0]], preferred_element_type=jnp.float32)
        for k in range(1, ksi):
            zi = zi + jnp.dot(wks[k], f1_ref[idx_ref[a, k]],
                              preferred_element_type=jnp.float32)
        zi_ref[a] = zi
        # skip 1x1 conv: only its statistics are needed here (values recomputed in kernel 3)
        zs = (jnp.dot(wsk, xs_ref[a], preferred_element_type=jnp.float32) + bsk) * maskf
        return (sum_i + jnp.sum(zi, axis=1, keepdims=True),
                ss_i + jnp.sum(zi * zi, axis=1, keepdims=True),
                sum_s + jnp.sum(zs, axis=1, keepdims=True),
                ss_s + jnp.sum(zs * zs, axis=1, keepdims=True))

    z0 = jnp.zeros((c_out, 1), jnp.float32)
    sum_i, ss_i, sum_s, ss_s = jax.lax.fori_loop(0, n_anchor, conv_body, (z0, z0, z0, z0))
    sti_ref[...] = jnp.concatenate([sum_i, ss_i], axis=1)
    sts_ref[...] = jnp.concatenate([sum_s, ss_s], axis=1)


def _combine_kernel(zi_ref, xs_ref, wsk_ref, bsk_ref, ssi_ref, sss_ref, o_ref, *, n_anchor):
    # InstanceNorm pass 2 + relu for intra and skip; skip conv recomputed in-kernel so z_skip
    # never round-trips HBM; residual add.
    sci = ssi_ref[:, 0:1]
    shi = ssi_ref[:, 1:2]
    scs = sss_ref[:, 0:1]
    shs = sss_ref[:, 1:2]
    wsk = wsk_ref[...]
    bsk = bsk_ref[...]

    def body(a, carry):
        fi = jnp.maximum(zi_ref[a] * sci + shi, 0.0)
        zs = jnp.dot(wsk, xs_ref[a], preferred_element_type=jnp.float32) + bsk
        fs = jnp.maximum(zs * scs + shs, 0.0)
        o_ref[a] = fi + fs
        return carry

    jax.lax.fori_loop(0, n_anchor, body, 0)


def separable_so3_conv_block(x_feats, xyz, anchors, inter_idx, inter_w, params):
    W_inter = params["W_inter"]      # [Cout, Cin*KS]   (columns: ci*KS + k)
    W_intra = params["W_intra"]      # [Cout, Cout*KSI] (columns: ci*KSI + k)
    intra_idx = params["intra_idx"]  # [A, KSI] int32
    W_skip = params["W_skip"]        # [Cout, Cin]
    b_skip = params["b_skip"]        # [Cout]

    B, C_IN, P, A = x_feats.shape
    KS, NN = inter_w.shape[3], inter_w.shape[4]
    C_OUT = W_inter.shape[0]
    KSI = intra_idx.shape[1]

    P_TILE, P_PAD = _pick_tiling(P, C_IN, C_OUT, KS, KSI, NN, A)
    n_pt = P_PAD // P_TILE

    # ---- glue: shadow-pad + neighbor gather into the NN-leading lane-dense layout ----
    # TODO(synk): move this gather in-kernel (scalar-prefetch/DMA inter_idx with HBM-resident
    # feats via memory_space=pl.ANY) so the NN-expanded tensor never hits HBM.
    fp = jnp.concatenate([x_feats, jnp.zeros((B, C_IN, 1, A), x_feats.dtype)], axis=2)
    fp_t = jnp.transpose(fp, (0, 3, 1, 2))                    # [B, A, Cin, P+1]
    idx_t = jnp.transpose(inter_idx, (0, 2, 1))               # [B, NN, P]

    def _gather_one(f, rows):                                 # f:[A,Cin,P+1], rows:[NN,P]
        return jax.vmap(lambda r: f[:, :, r])(rows)           # -> [NN, A, Cin, P]

    g = jax.vmap(_gather_one)(fp_t, idx_t)                    # [B, NN, A, Cin, P]
    g = jnp.pad(g, ((0, 0), (0, 0), (0, 0), (0, 0), (0, P_PAD - P)))
    # TODO(synk): the inter_w transpose is one extra HBM pass of the 2nd-largest input; fold it
    # into the producer or enable allow_input_fusion once validated on the target toolchain.
    w = jnp.transpose(inter_w, (0, 4, 2, 3, 1))               # [B, NN, A, KS, P]
    w = jnp.pad(w, ((0, 0), (0, 0), (0, 0), (0, 0), (0, P_PAD - P)))
    xs = jnp.transpose(x_feats, (0, 3, 1, 2))                 # [B, A, Cin, P]
    xs = jnp.pad(xs, ((0, 0), (0, 0), (0, 0), (0, P_PAD - P)))

    # reorder conv weights to k-major contracting layout (matches in-kernel k-major staging)
    W_inter_r = W_inter.reshape(C_OUT, C_IN, KS).transpose(0, 2, 1).reshape(C_OUT, KS * C_IN)
    W_intra_r = W_intra.reshape(C_OUT, C_OUT, KSI).transpose(0, 2, 1).reshape(C_OUT, KSI * C_OUT)
    bsk = b_skip.reshape(C_OUT, 1)

    # ---- kernel 1: inter SO3 conv (neighbor reduce + fused fat-K matmul) + norm stats ----
    z_inter, st_inter = pl.pallas_call(
        functools.partial(_inter_kernel, ks=KS, nn=NN, c_in=C_IN),
        out_shape=(jax.ShapeDtypeStruct((B, A, C_OUT, P_PAD), jnp.float32),
                   jax.ShapeDtypeStruct((B, A, C_OUT, 2), jnp.float32)),
        grid=(B, A, n_pt),
        in_specs=[
            pl.BlockSpec((None, NN, None, C_IN, P_TILE), lambda b, a, t: (b, 0, a, 0, t)),
            pl.BlockSpec((None, NN, None, KS, P_TILE), lambda b, a, t: (b, 0, a, 0, t)),
            pl.BlockSpec((C_OUT, KS * C_IN), lambda b, a, t: (0, 0)),     # weights resident
        ],
        out_specs=(
            pl.BlockSpec((None, None, C_OUT, P_TILE), lambda b, a, t: (b, a, 0, t)),
            pl.BlockSpec((None, None, C_OUT, 2), lambda b, a, t: (b, a, 0, 0)),  # per-(b,a) stats
        ),
        scratch_shapes=[pltpu.VMEM((KS * C_IN, P_TILE), jnp.float32)],
        compiler_params=pltpu.CompilerParams(
            dimension_semantics=("parallel", "parallel", "arbitrary"),
            vmem_limit_bytes=VMEM_LIMIT),
    )(g, w, W_inter_r)

    n_spatial = float(P * A)

    def _scale_shift(st):
        s = jnp.sum(st, axis=1)                               # reduce the split grid axis
        mean = s[..., 0] / n_spatial
        var = jnp.maximum(s[..., 1] / n_spatial - mean * mean, 0.0)
        scale = jax.lax.rsqrt(var + EPS)
        return jnp.stack([scale, -mean * scale], axis=-1)     # (B, Cout, 2)

    ssn_inter = _scale_shift(st_inter)

    # ---- kernel 2: apply inter norm, intra SO3 conv (in-VMEM anchor gather), skip stats ----
    z_intra, st_intra, st_skip = pl.pallas_call(
        functools.partial(_intra_kernel, ksi=KSI, n_anchor=A, n_valid=P,
                          p_tile=P_TILE, c_out=C_OUT),
        out_shape=(jax.ShapeDtypeStruct((B, A, C_OUT, P_PAD), jnp.float32),
                   jax.ShapeDtypeStruct((B, n_pt, C_OUT, 2), jnp.float32),
                   jax.ShapeDtypeStruct((B, n_pt, C_OUT, 2), jnp.float32)),
        grid_spec=pltpu.PrefetchScalarGridSpec(
            num_scalar_prefetch=1,
            grid=(B, n_pt),
            in_specs=[
                pl.BlockSpec((None, A, C_OUT, P_TILE), lambda b, t, idx: (b, 0, 0, t)),
                pl.BlockSpec((None, C_OUT, 2), lambda b, t, idx: (b, 0, 0)),
                pl.BlockSpec((None, A, C_IN, P_TILE), lambda b, t, idx: (b, 0, 0, t)),
                pl.BlockSpec((C_OUT, KSI * C_OUT), lambda b, t, idx: (0, 0)),
                pl.BlockSpec((C_OUT, C_IN), lambda b, t, idx: (0, 0)),
                pl.BlockSpec((C_OUT, 1), lambda b, t, idx: (0, 0)),
            ],
            out_specs=(
                pl.BlockSpec((None, A, C_OUT, P_TILE), lambda b, t, idx: (b, 0, 0, t)),
                pl.BlockSpec((None, None, C_OUT, 2), lambda b, t, idx: (b, t, 0, 0)),
                pl.BlockSpec((None, None, C_OUT, 2), lambda b, t, idx: (b, t, 0, 0)),
            ),
            scratch_shapes=[pltpu.VMEM((A, C_OUT, P_TILE), jnp.float32)],
        ),
        compiler_params=pltpu.CompilerParams(
            dimension_semantics=("parallel", "parallel"),
            vmem_limit_bytes=VMEM_LIMIT),
    )(intra_idx.astype(jnp.int32), z_inter, ssn_inter, xs, W_intra_r, W_skip, bsk)

    ssn_intra = _scale_shift(st_intra)
    ssn_skip = _scale_shift(st_skip)

    # ---- kernel 3: apply intra/skip norms + relu, recompute skip 1x1 conv, residual add ----
    out_pad = pl.pallas_call(
        functools.partial(_combine_kernel, n_anchor=A),
        out_shape=jax.ShapeDtypeStruct((B, A, C_OUT, P_PAD), jnp.float32),
        grid=(B, n_pt),
        in_specs=[
            pl.BlockSpec((None, A, C_OUT, P_TILE), lambda b, t: (b, 0, 0, t)),
            pl.BlockSpec((None, A, C_IN, P_TILE), lambda b, t: (b, 0, 0, t)),
            pl.BlockSpec((C_OUT, C_IN), lambda b, t: (0, 0)),
            pl.BlockSpec((C_OUT, 1), lambda b, t: (0, 0)),
            pl.BlockSpec((None, C_OUT, 2), lambda b, t: (b, 0, 0)),
            pl.BlockSpec((None, C_OUT, 2), lambda b, t: (b, 0, 0)),
        ],
        out_specs=pl.BlockSpec((None, A, C_OUT, P_TILE), lambda b, t: (b, 0, 0, t)),
        compiler_params=pltpu.CompilerParams(
            dimension_semantics=("parallel", "parallel"),
            vmem_limit_bytes=VMEM_LIMIT),
    )(z_intra, xs, W_skip, bsk, ssn_intra, ssn_skip)

    out_feats = jnp.transpose(out_pad, (0, 2, 3, 1))[:, :, :P, :]   # -> [B, Cout, P, A]

    sample_idx = None  # stride == 1 path (no downsampling)
    # TODO(synk): stride > 1 path (FPS sampling + batched_index_select of the skip feature).
    return inter_idx, inter_w, sample_idx, (xyz, out_feats, anchors)


def _reference(x_feats, inter_idx, inter_w, params):
    """Pure-JAX reference with PyTorch semantics (for the self-check)."""
    W_inter, W_intra = params["W_inter"], params["W_intra"]
    intra_idx, W_skip, b_skip = params["intra_idx"], params["W_skip"], params["b_skip"]
    B, C_IN, P, A = x_feats.shape
    KS, NN = inter_w.shape[3], inter_w.shape[4]
    C_OUT = W_inter.shape[0]
    KSI = intra_idx.shape[1]

    def inorm_relu(z):
        m = jnp.mean(z, axis=(2, 3), keepdims=True)
        v = jnp.mean((z - m) ** 2, axis=(2, 3), keepdims=True)
        return jnp.maximum((z - m) * jax.lax.rsqrt(v + EPS), 0.0)

    fp = jnp.concatenate([x_feats, jnp.zeros((B, C_IN, 1, A), x_feats.dtype)], axis=2)
    g = jax.vmap(lambda f, i: f[:, i, :])(fp, inter_idx)               # [B, Cin, P, NN, A]
    kf = jnp.einsum('bcpna,bpakn->bckpa', g, inter_w)                  # [B, Cin, KS, P, A]
    z1 = jnp.einsum('bckpa,ock->bopa', kf, W_inter.reshape(C_OUT, C_IN, KS))
    f1 = inorm_relu(z1)
    gi = f1[:, :, :, intra_idx]                                        # [B, Cout, P, A, KSI]
    z2 = jnp.einsum('bcpak,ock->bopa', gi, W_intra.reshape(C_OUT, C_OUT, KSI))
    f2 = inorm_relu(z2)
    z3 = jnp.einsum('oc,bcpa->bopa', W_skip, x_feats) + b_skip[None, :, None, None]
    f3 = inorm_relu(z3)
    return f2 + f3


if __name__ == "__main__":
    B, C_IN, C_OUT, P, A, KS, NN, KSI = 2, 4, 8, 16, 4, 3, 8, 3

    key = jax.random.PRNGKey(0)
    keys = jax.random.split(key, 10)
    x_feats = jax.random.normal(keys[0], (B, C_IN, P, A), jnp.float32)
    xyz = jax.random.normal(keys[1], (B, 3, P), jnp.float32)
    anchors = jax.random.normal(keys[2], (A, 3, 3), jnp.float32)
    inter_idx = jax.random.randint(keys[3], (B, P, NN), 0, P + 1, dtype=jnp.int32)  # P == shadow
    inter_w = jax.random.uniform(keys[4], (B, P, A, KS, NN), jnp.float32)

    params = {
        "W_inter": 0.1 * jax.random.normal(keys[5], (C_OUT, C_IN * KS), jnp.float32),
        "W_intra": 0.1 * jax.random.normal(keys[6], (C_OUT, C_OUT * KSI), jnp.float32),
        "W_skip": 0.1 * jax.random.normal(keys[7], (C_OUT, C_IN), jnp.float32),
        "b_skip": 0.1 * jax.random.normal(keys[8], (C_OUT,), jnp.float32),
        # fixed anchor-graph neighborhood: each anchor + its two ring neighbors
        "intra_idx": jnp.stack(
            [jnp.arange(A), (jnp.arange(A) + 1) % A, (jnp.arange(A) - 1) % A], axis=1
        ).astype(jnp.int32),
    }

    fwd = jax.jit(separable_so3_conv_block)
    inter_idx_o, inter_w_o, sample_idx_o, (xyz_o, feats_o, anchors_o) = fwd(
        x_feats, xyz, anchors, inter_idx, inter_w, params)
    jax.block_until_ready(feats_o)

    assert feats_o.shape == (B, C_OUT, P, A)
    assert bool(jnp.all(jnp.isfinite(feats_o)))

    ref = _reference(x_feats, inter_idx, inter_w, params)
    max_err = float(jnp.max(jnp.abs(feats_o - ref)))
    assert bool(jnp.allclose(feats_o, ref, atol=2e-3, rtol=2e-3)), f"max_err={max_err}"
    print("KERNEL_OK")
</pallas_src>

<mosaic_0001>
module attributes {stable_mosaic.version = 11 : i64} {
  func.func @_inter_kernel(%arg0: i32, %arg1: i32, %arg2: i32, %arg3: memref<1x8x1x4x128xf32, #tpu.memory_space<vmem>>, %arg4: memref<1x8x1x3x128xf32, #tpu.memory_space<vmem>>, %arg5: memref<8x12xf32, #tpu.memory_space<vmem>>, %arg6: memref<1x1x8x128xf32, #tpu.memory_space<vmem>>, %arg7: memref<1x1x8x2xf32, #tpu.memory_space<vmem>>, %arg8: memref<12x128xf32, #tpu.memory_space<vmem>>) attributes {dimension_semantics = [#tpu.dimension_semantics<parallel>, #tpu.dimension_semantics<parallel>, #tpu.dimension_semantics<arbitrary>], iteration_bounds = array<i64: 2, 4, 1>, scalar_prefetch = 0 : i64, scratch_operands = 1 : i64, tpu.core_type = #tpu.core_type<tc>, window_params = [{transform_indices = @transform_0, window_bounds = array<i64: 1, 8, 1, 4, 128>}, {transform_indices = @transform_1, window_bounds = array<i64: 1, 8, 1, 3, 128>}, {pipeline_mode = #tpu.pipeline_mode<synchronous>, transform_indices = @transform_2, window_bounds = array<i64: 8, 12>}, {transform_indices = @transform_3, window_bounds = array<i64: 1, 1, 8, 128>}, {transform_indices = @transform_4, window_bounds = array<i64: 1, 1, 8, 2>}]} {
    %c0 = arith.constant 0 : index
    %c0_0 = arith.constant 0 : index
    %c0_1 = arith.constant 0 : index
    %c0_2 = arith.constant 0 : index
    %c0_3 = arith.constant 0 : index
    %0 = vector.load %arg3[%c0, %c0_0, %c0_1, %c0_2, %c0_3] : memref<1x8x1x4x128xf32, #tpu.memory_space<vmem>>, vector<1x1x1x4x128xf32>
    %1 = vector.shape_cast %0 : vector<1x1x1x4x128xf32> to vector<4x128xf32>
    %c0_4 = arith.constant 0 : index
    %c0_5 = arith.constant 0 : index
    %c0_6 = arith.constant 0 : index
    %c0_7 = arith.constant 0 : index
    %c0_8 = arith.constant 0 : index
    %2 = vector.load %arg4[%c0_4, %c0_5, %c0_6, %c0_7, %c0_8] : memref<1x8x1x3x128xf32, #tpu.memory_space<vmem>>, vector<1x1x1x1x128xf32>
    %3 = vector.shape_cast %2 : vector<1x1x1x1x128xf32> to vector<1x128xf32>
    %4 = vector.broadcast %3 : vector<1x128xf32> to vector<4x128xf32>
    %5 = arith.mulf %1, %4 : vector<4x128xf32>
    %c0_9 = arith.constant 0 : index
    %c1 = arith.constant 1 : index
    %c0_10 = arith.constant 0 : index
    %c0_11 = arith.constant 0 : index
    %c0_12 = arith.constant 0 : index
    %6 = vector.load %arg3[%c0_9, %c1, %c0_10, %c0_11, %c0_12] : memref<1x8x1x4x128xf32, #tpu.memory_space<vmem>>, vector<1x1x1x4x128xf32>
    %7 = vector.shape_cast %6 : vector<1x1x1x4x128xf32> to vector<4x128xf32>
    %c0_13 = arith.constant 0 : index
    %c1_14 = arith.constant 1 : index
    %c0_15 = arith.constant 0 : index
    %c0_16 = arith.constant 0 : index
    %c0_17 = arith.constant 0 : index
    %8 = vector.load %arg4[%c0_13, %c1_14, %c0_15, %c0_16, %c0_17] : memref<1x8x1x3x128xf32, #tpu.memory_space<vmem>>, vector<1x1x1x1x128xf32>
    %9 = vector.shape_cast %8 : vector<1x1x1x1x128xf32> to vector<1x128xf32>
    %10 = vector.broadcast %9 : vector<1x128xf32> to vector<4x128xf32>
    %11 = arith.mulf %7, %10 : vector<4x128xf32>
    %12 = arith.addf %5, %11 : vector<4x128xf32>
    %c0_18 = arith.constant 0 : index
    %c2 = arith.constant 2 : index
    %c0_19 = arith.constant 0 : index
    %c0_20 = arith.constant 0 : index
    %c0_21 = arith.constant 0 : index
    %13 = vector.load %arg3[%c0_18, %c2, %c0_19, %c0_20, %c0_21] : memref<1x8x1x4x128xf32, #tpu.memory_space<vmem>>, vector<1x1x1x4x128xf32>
    %14 = vector.shape_cast %13 : vector<1x1x1x4x128xf32> to vector<4x128xf32>
    %c0_22 = arith.constant 0 : index
    %c2_23 = arith.constant 2 : index
    %c0_24 = arith.constant 0 : index
    %c0_25 = arith.constant 0 : index
    %c0_26 = arith.constant 0 : index
    %15 = vector.load %arg4[%c0_22, %c2_23, %c0_24, %c0_25, %c0_26] : memref<1x8x1x3x128xf32, #tpu.memory_space<vmem>>, vector<1x1x1x1x128xf32>
    %16 = vector.shape_cast %15 : vector<1x1x1x1x128xf32> to vector<1x128xf32>
    %17 = vector.broadcast %16 : vector<1x128xf32> to vector<4x128xf32>
    %18 = arith.mulf %14, %17 : vector<4x128xf32>
    %19 = arith.addf %12, %18 : vector<4x128xf32>
    %c0_27 = arith.constant 0 : index
    %c3 = arith.constant 3 : index
    %c0_28 = arith.constant 0 : index
    %c0_29 = arith.constant 0 : index
    %c0_30 = arith.constant 0 : index
    %20 = vector.load %arg3[%c0_27, %c3, %c0_28, %c0_29, %c0_30] : memref<1x8x1x4x128xf32, #tpu.memory_space<vmem>>, vector<1x1x1x4x128xf32>
    %21 = vector.shape_cast %20 : vector<1x1x1x4x128xf32> to vector<4x128xf32>
    %c0_31 = arith.constant 0 : index
    %c3_32 = arith.constant 3 : index
    %c0_33 = arith.constant 0 : index
    %c0_34 = arith.constant 0 : index
    %c0_35 = arith.constant 0 : index
    %22 = vector.load %arg4[%c0_31, %c3_32, %c0_33, %c0_34, %c0_35] : memref<1x8x1x3x128xf32, #tpu.memory_space<vmem>>, vector<1x1x1x1x128xf32>
    %23 = vector.shape_cast %22 : vector<1x1x1x1x128xf32> to vector<1x128xf32>
    %24 = vector.broadcast %23 : vector<1x128xf32> to vector<4x128xf32>
    %25 = arith.mulf %21, %24 : vector<4x128xf32>
    %26 = arith.addf %19, %25 : vector<4x128xf32>
    %c0_36 = arith.constant 0 : index
    %c4 = arith.constant 4 : index
    %c0_37 = arith.constant 0 : index
    %c0_38 = arith.constant 0 : index
    %c0_39 = arith.constant 0 : index
    %27 = vector.load %arg3[%c0_36, %c4, %c0_37, %c0_38, %c0_39] : memref<1x8x1x4x128xf32, #tpu.memory_space<vmem>>, vector<1x1x1x4x128xf32>
    %28 = vector.shape_cast %27 : vector<1x1x1x4x128xf32> to vector<4x128xf32>
    %c0_40 = arith.constant 0 : index
    %c4_41 = arith.constant 4 : index
    %c0_42 = arith.constant 0 : index
    %c0_43 = arith.constant 0 : index
    %c0_44 = arith.constant 0 : index
    %29 = vector.load %arg4[%c0_40, %c4_41, %c0_42, %c0_43, %c0_44] : memref<1x8x1x3x128xf32, #tpu.memory_space<vmem>>, vector<1x1x1x1x128xf32>
    %30 = vector.shape_cast %29 : vector<1x1x1x1x128xf32> to vector<1x128xf32>
    %31 = vector.broadcast %30 : vector<1x128xf32> to vector<4x128xf32>
    %32 = arith.mulf %28, %31 : vector<4x128xf32>
    %33 = arith.addf %26, %32 : vector<4x128xf32>
    %c0_45 = arith.constant 0 : index
    %c5 = arith.constant 5 : index
    %c0_46 = arith.constant 0 : index
    %c0_47 = arith.constant 0 : index
    %c0_48 = arith.constant 0 : index
    %34 = vector.load %arg3[%c0_45, %c5, %c0_46, %c0_47, %c0_48] : memref<1x8x1x4x128xf32, #tpu.memory_space<vmem>>, vector<1x1x1x4x128xf32>
    %35 = vector.shape_cast %34 : vector<1x1x1x4x128xf32> to vector<4x128xf32>
    %c0_49 = arith.constant 0 : index
    %c5_50 = arith.constant 5 : index
    %c0_51 = arith.constant 0 : index
    %c0_52 = arith.constant 0 : index
    %c0_53 = arith.constant 0 : index
    %36 = vector.load %arg4[%c0_49, %c5_50, %c0_51, %c0_52, %c0_53] : memref<1x8x1x3x128xf32, #tpu.memory_space<vmem>>, vector<1x1x1x1x128xf32>
    %37 = vector.shape_cast %36 : vector<1x1x1x1x128xf32> to vector<1x128xf32>
    %38 = vector.broadcast %37 : vector<1x128xf32> to vector<4x128xf32>
    %39 = arith.mulf %35, %38 : vector<4x128xf32>
    %40 = arith.addf %33, %39 : vector<4x128xf32>
    %c0_54 = arith.constant 0 : index
    %c6 = arith.constant 6 : index
    %c0_55 = arith.constant 0 : index
    %c0_56 = arith.constant 0 : index
    %c0_57 = arith.constant 0 : index
    %41 = vector.load %arg3[%c0_54, %c6, %c0_55, %c0_56, %c0_57] : memref<1x8x1x4x128xf32, #tpu.memory_space<vmem>>, vector<1x1x1x4x128xf32>
    %42 = vector.shape_cast %41 : vector<1x1x1x4x128xf32> to vector<4x128xf32>
    %c0_58 = arith.constant 0 : index
    %c6_59 = arith.constant 6 : index
    %c0_60 = arith.constant 0 : index
    %c0_61 = arith.constant 0 : index
    %c0_62 = arith.constant 0 : index
    %43 = vector.load %arg4[%c0_58, %c6_59, %c0_60, %c0_61, %c0_62] : memref<1x8x1x3x128xf32, #tpu.memory_space<vmem>>, vector<1x1x1x1x128xf32>
    %44 = vector.shape_cast %43 : vector<1x1x1x1x128xf32> to vector<1x128xf32>
    %45 = vector.broadcast %44 : vector<1x128xf32> to vector<4x128xf32>
    %46 = arith.mulf %42, %45 : vector<4x128xf32>
    %47 = arith.addf %40, %46 : vector<4x128xf32>
    %c0_63 = arith.constant 0 : index
    %c7 = arith.constant 7 : index
    %c0_64 = arith.constant 0 : index
    %c0_65 = arith.constant 0 : index
    %c0_66 = arith.constant 0 : index
    %48 = vector.load %arg3[%c0_63, %c7, %c0_64, %c0_65, %c0_66] : memref<1x8x1x4x128xf32, #tpu.memory_space<vmem>>, vector<1x1x1x4x128xf32>
    %49 = vector.shape_cast %48 : vector<1x1x1x4x128xf32> to vector<4x128xf32>
    %c0_67 = arith.constant 0 : index
    %c7_68 = arith.constant 7 : index
    %c0_69 = arith.constant 0 : index
    %c0_70 = arith.constant 0 : index
    %c0_71 = arith.constant 0 : index
    %50 = vector.load %arg4[%c0_67, %c7_68, %c0_69, %c0_70, %c0_71] : memref<1x8x1x3x128xf32, #tpu.memory_space<vmem>>, vector<1x1x1x1x128xf32>
    %51 = vector.shape_cast %50 : vector<1x1x1x1x128xf32> to vector<1x128xf32>
    %52 = vector.broadcast %51 : vector<1x128xf32> to vector<4x128xf32>
    %53 = arith.mulf %49, %52 : vector<4x128xf32>
    %54 = arith.addf %47, %53 : vector<4x128xf32>
    %c0_72 = arith.constant 0 : index
    %c0_73 = arith.constant 0 : index
    %55 = vector.load %arg8[%c0_72, %c0_73] : memref<12x128xf32, #tpu.memory_space<vmem>>, vector<4x128xf32>
    tpu.vector_store %arg8[%c0_72, %c0_73], %54 {strides = array<i32>} : memref<12x128xf32, #tpu.memory_space<vmem>>, vector<4x128xf32>,
    %c0_74 = arith.constant 0 : index
    %c0_75 = arith.constant 0 : index
    %c0_76 = arith.constant 0 : index
    %c0_77 = arith.constant 0 : index
    %c0_78 = arith.constant 0 : index
    %56 = vector.load %arg3[%c0_74, %c0_75, %c0_76, %c0_77, %c0_78] : memref<1x8x1x4x128xf32, #tpu.memory_space<vmem>>, vector<1x1x1x4x128xf32>
    %57 = vector.shape_cast %56 : vector<1x1x1x4x128xf32> to vector<4x128xf32>
    %c0_79 = arith.constant 0 : index
    %c0_80 = arith.constant 0 : index
    %c0_81 = arith.constant 0 : index
    %c1_82 = arith.constant 1 : index
    %c0_83 = arith.constant 0 : index
    %58 = vector.load %arg4[%c0_79, %c0_80, %c0_81, %c1_82, %c0_83] : memref<1x8x1x3x128xf32, #tpu.memory_space<vmem>>, vector<1x1x1x1x128xf32>
    %59 = vector.shape_cast %58 : vector<1x1x1x1x128xf32> to vector<1x128xf32>
    %60 = vector.broadcast %59 : vector<1x128xf32> to vector<4x128xf32>
    %61 = arith.mulf %57, %60 : vector<4x128xf32>
    %c0_84 = arith.constant 0 : index
    %c1_85 = arith.constant 1 : index
    %c0_86 = arith.constant 0 : index
    %c0_87 = arith.constant 0 : index
    %c0_88 = arith.constant 0 : index
    %62 = vector.load %arg3[%c0_84, %c1_85, %c0_86, %c0_87, %c0_88] : memref<1x8x1x4x128xf32, #tpu.memory_space<vmem>>, vector<1x1x1x4x128xf32>
    %63 = vector.shape_cast %62 : vector<1x1x1x4x128xf32> to vector<4x128xf32>
    %c0_89 = arith.constant 0 : index
    %c1_90 = arith.constant 1 : index
    %c0_91 = arith.constant 0 : index
    %c1_92 = arith.constant 1 : index
    %c0_93 = arith.constant 0 : index
    %64 = vector.load %arg4[%c0_89, %c1_90, %c0_91, %c1_92, %c0_93] : memref<1x8x1x3x128xf32, #tpu.memory_space<vmem>>, vector<1x1x1x1x128xf32>
    %65 = vector.shape_cast %64 : vector<1x1x1x1x128xf32> to vector<1x128xf32>
    %66 = vector.broadcast %65 : vector<1x128xf32> to vector<4x128xf32>
    %67 = arith.mulf %63, %66 : vector<4x128xf32>
    %68 = arith.addf %61, %67 : vector<4x128xf32>
    %c0_94 = arith.constant 0 : index
    %c2_95 = arith.constant 2 : index
    %c0_96 = arith.constant 0 : index
    %c0_97 = arith.constant 0 : index
    %c0_98 = arith.constant 0 : index
    %69 = vector.load %arg3[%c0_94, %c2_95, %c0_96, %c0_97, %c0_98] : memref<1x8x1x4x128xf32, #tpu.memory_space<vmem>>, vector<1x1x1x4x128xf32>
    %70 = vector.shape_cast %69 : vector<1x1x1x4x128xf32> to vector<4x128xf32>
    %c0_99 = arith.constant 0 : index
    %c2_100 = arith.constant 2 : index
    %c0_101 = arith.constant 0 : index
    %c1_102 = arith.constant 1 : index
    %c0_103 = arith.constant 0 : index
    %71 = vector.load %arg4[%c0_99, %c2_100, %c0_101, %c1_102, %c0_103] : memref<1x8x1x3x128xf32, #tpu.memory_space<vmem>>, vector<1x1x1x1x128xf32>
    %72 = vector.shape_cast %71 : vector<1x1x1x1x128xf32> to vector<1x128xf32>
    %73 = vector.broadcast %72 : vector<1x128xf32> to vector<4x128xf32>
    %74 = arith.mulf %70, %73 : vector<4x128xf32>
    %75 = arith.addf %68, %74 : vector<4x128xf32>
    %c0_104 = arith.constant 0 : index
    %c3_105 = arith.constant 3 : index
    %c0_106 = arith.constant 0 : index
    %c0_107 = arith.constant 0 : index
    %c0_108 = arith.constant 0 : index
    %76 = vector.load %arg3[%c0_104, %c3_105, %c0_106, %c0_107, %c0_108] : memref<1x8x1x4x128xf32, #tpu.memory_space<vmem>>, vector<1x1x1x4x128xf32>
    %77 = vector.shape_cast %76 : vector<1x1x1x4x128xf32> to vector<4x128xf32>
    %c0_109 = arith.constant 0 : index
    %c3_110 = arith.constant 3 : index
    %c0_111 = arith.constant 0 : index
    %c1_112 = arith.constant 1 : index
    %c0_113 = arith.constant 0 : index
    %78 = vector.load %arg4[%c0_109, %c3_110, %c0_111, %c1_112, %c0_113] : memref<1x8x1x3x128xf32, #tpu.memory_space<vmem>>, vector<1x1x1x1x128xf32>
    %79 = vector.shape_cast %78 : vector<1x1x1x1x128xf32> to vector<1x128xf32>
    %80 = vector.broadcast %79 : vector<1x128xf32> to vector<4x128xf32>
    %81 = arith.mulf %77, %80 : vector<4x128xf32>
    %82 = arith.addf %75, %81 : vector<4x128xf32>
    %c0_114 = arith.constant 0 : index
    %c4_115 = arith.constant 4 : index
    %c0_116 = arith.constant 0 : index
    %c0_117 = arith.constant 0 : index
    %c0_118 = arith.constant 0 : index
    %83 = vector.load %arg3[%c0_114, %c4_115, %c0_116, %c0_117, %c0_118] : memref<1x8x1x4x128xf32, #tpu.memory_space<vmem>>, vector<1x1x1x4x128xf32>
    %84 = vector.shape_cast %83 : vector<1x1x1x4x128xf32> to vector<4x128xf32>
    %c0_119 = arith.constant 0 : index
    %c4_120 = arith.constant 4 : index
    %c0_121 = arith.constant 0 : index
    %c1_122 = arith.constant 1 : index
    %c0_123 = arith.constant 0 : index
    %85 = vector.load %arg4[%c0_119, %c4_120, %c0_121, %c1_122, %c0_123] : memref<1x8x1x3x128xf32, #tpu.memory_space<vmem>>, vector<1x1x1x1x128xf32>
    %86 = vector.shape_cast %85 : vector<1x1x1x1x128xf32> to vector<1x128xf32>
    %87 = vector.broadcast %86 : vector<1x128xf32> to vector<4x128xf32>
    %88 = arith.mulf %84, %87 : vector<4x128xf32>
    %89 = arith.addf %82, %88 : vector<4x128xf32>
    %c0_124 = arith.constant 0 : index
    %c5_125 = arith.constant 5 : index
    %c0_126 = arith.constant 0 : index
    %c0_127 = arith.constant 0 : index
    %c0_128 = arith.constant 0 : index
    %90 = vector.load %arg3[%c0_124, %c5_125, %c0_126, %c0_127, %c0_128] : memref<1x8x1x4x128xf32, #tpu.memory_space<vmem>>, vector<1x1x1x4x128xf32>
    %91 = vector.shape_cast %90 : vector<1x1x1x4x128xf32> to vector<4x128xf32>
    %c0_129 = arith.constant 0 : index
    %c5_130 = arith.constant 5 : index
    %c0_131 = arith.constant 0 : index
    %c1_132 = arith.constant 1 : index
    %c0_133 = arith.constant 0 : index
    %92 = vector.load %arg4[%c0_129, %c5_130, %c0_131, %c1_132, %c0_133] : memref<1x8x1x3x128xf32, #tpu.memory_space<vmem>>, vector<1x1x1x1x128xf32>
    %93 = vector.shape_cast %92 : vector<1x1x1x1x128xf32> to vector<1x128xf32>
    %94 = vector.broadcast %93 : vector<1x128xf32> to vector<4x128xf32>
    %95 = arith.mulf %91, %94 : vector<4x128xf32>
    %96 = arith.addf %89, %95 : vector<4x128xf32>
    %c0_134 = arith.constant 0 : index
    %c6_135 = arith.constant 6 : index
    %c0_136 = arith.constant 0 : index
    %c0_137 = arith.constant 0 : index
    %c0_138 = arith.constant 0 : index
    %97 = vector.load %arg3[%c0_134, %c6_135, %c0_136, %c0_137, %c0_138] : memref<1x8x1x4x128xf32, #tpu.memory_space<vmem>>, vector<1x1x1x4x128xf32>
    %98 = vector.shape_cast %97 : vector<1x1x1x4x128xf32> to vector<4x128xf32>
    %c0_139 = arith.constant 0 : index
    %c6_140 = arith.constant 6 : index
    %c0_141 = arith.constant 0 : index
    %c1_142 = arith.constant 1 : index
    %c0_143 = arith.constant 0 : index
    %99 = vector.load %arg4[%c0_139, %c6_140, %c0_141, %c1_142, %c0_143] : memref<1x8x1x3x128xf32, #tpu.memory_space<vmem>>, vector<1x1x1x1x128xf32>
    %100 = vector.shape_cast %99 : vector<1x1x1x1x128xf32> to vector<1x128xf32>
    %101 = vector.broadcast %100 : vector<1x128xf32> to vector<4x128xf32>
    %102 = arith.mulf %98, %101 : vector<4x128xf32>
    %103 = arith.addf %96, %102 : vector<4x128xf32>
    %c0_144 = arith.constant 0 : index
    %c7_145 = arith.constant 7 : index
    %c0_146 = arith.constant 0 : index
    %c0_147 = arith.constant 0 : index
    %c0_148 = arith.constant 0 : index
    %104 = vector.load %arg3[%c0_144, %c7_145, %c0_146, %c0_147, %c0_148] : memref<1x8x1x4x128xf32, #tpu.memory_space<vmem>>, vector<1x1x1x4x128xf32>
    %105 = vector.shape_cast %104 : vector<1x1x1x4x128xf32> to vector<4x128xf32>
    %c0_149 = arith.constant 0 : index
    %c7_150 = arith.constant 7 : index
    %c0_151 = arith.constant 0 : index
    %c1_152 = arith.constant 1 : index
    %c0_153 = arith.constant 0 : index
    %106 = vector.load %arg4[%c0_149, %c7_150, %c0_151, %c1_152, %c0_153] : memref<1x8x1x3x128xf32, #tpu.memory_space<vmem>>, vector<1x1x1x1x128xf32>
    %107 = vector.shape_cast %106 : vector<1x1x1x1x128xf32> to vector<1x128xf32>
    %108 = vector.broadcast %107 : vector<1x128xf32> to vector<4x128xf32>
    %109 = arith.mulf %105, %108 : vector<4x128xf32>
    %110 = arith.addf %103, %109 : vector<4x128xf32>
    %c4_154 = arith.constant 4 : index
    %c0_155 = arith.constant 0 : index
    %111 = vector.load %arg8[%c4_154, %c0_155] : memref<12x128xf32, #tpu.memory_space<vmem>>, vector<4x128xf32>
    tpu.vector_store %arg8[%c4_154, %c0_155], %110 {strides = array<i32>} : memref<12x128xf32, #tpu.memory_space<vmem>>, vector<4x128xf32>,
    %c0_156 = arith.constant 0 : index
    %c0_157 = arith.constant 0 : index
    %c0_158 = arith.constant 0 : index
    %c0_159 = arith.constant 0 : index
    %c0_160 = arith.constant 0 : index
    %112 = vector.load %arg3[%c0_156, %c0_157, %c0_158, %c0_159, %c0_160] : memref<1x8x1x4x128xf32, #tpu.memory_space<vmem>>, vector<1x1x1x4x128xf32>
    %113 = vector.shape_cast %112 : vector<1x1x1x4x128xf32> to vector<4x128xf32>
    %c0_161 = arith.constant 0 : index
    %c0_162 = arith.constant 0 : index
    %c0_163 = arith.constant 0 : index
    %c2_164 = arith.constant 2 : index
    %c0_165 = arith.constant 0 : index
    %114 = vector.load %arg4[%c0_161, %c0_162, %c0_163, %c2_164, %c0_165] : memref<1x8x1x3x128xf32, #tpu.memory_space<vmem>>, vector<1x1x1x1x128xf32>
    %115 = vector.shape_cast %114 : vector<1x1x1x1x128xf32> to vector<1x128xf32>
    %116 = vector.broadcast %115 : vector<1x128xf32> to vector<4x128xf32>
    %117 = arith.mulf %113, %116 : vector<4x128xf32>
    %c0_166 = arith.constant 0 : index
    %c1_167 = arith.constant 1 : index
    %c0_168 = arith.constant 0 : index
    %c0_169 = arith.constant 0 : index
    %c0_170 = arith.constant 0 : index
    %118 = vector.load %arg3[%c0_166, %c1_167, %c0_168, %c0_169, %c0_170] : memref<1x8x1x4x128xf32, #tpu.memory_space<vmem>>, vector<1x1x1x4x128xf32>
    %119 = vector.shape_cast %118 : vector<1x1x1x4x128xf32> to vector<4x128xf32>
    %c0_171 = arith.constant 0 : index
    %c1_172 = arith.constant 1 : index
    %c0_173 = arith.constant 0 : index
    %c2_174 = arith.constant 2 : index
    %c0_175 = arith.constant 0 : index
    %120 = vector.load %arg4[%c0_171, %c1_172, %c0_173, %c2_174, %c0_175] : memref<1x8x1x3x128xf32, #tpu.memory_space<vmem>>, vector<1x1x1x1x128xf32>
    %121 = vector.shape_cast %120 : vector<1x1x1x1x128xf32> to vector<1x128xf32>
    %122 = vector.broadcast %121 : vector<1x128xf32> to vector<4x128xf32>
    %123 = arith.mulf %119, %122 : vector<4x128xf32>
    %124 = arith.addf %117, %123 : vector<4x128xf32>
    %c0_176 = arith.constant 0 : index
    %c2_177 = arith.constant 2 : index
    %c0_178 = arith.constant 0 : index
    %c0_179 = arith.constant 0 : index
    %c0_180 = arith.constant 0 : index
    %125 = vector.load %arg3[%c0_176, %c2_177, %c0_178, %c0_179, %c0_180] : memref<1x8x1x4x128xf32, #tpu.memory_space<vmem>>, vector<1x1x1x4x128xf32>
    %126 = vector.shape_cast %125 : vector<1x1x1x4x128xf32> to vector<4x128xf32>
    %c0_181 = arith.constant 0 : index
    %c2_182 = arith.constant 2 : index
    %c0_183 = arith.constant 0 : index
    %c2_184 = arith.constant 2 : index
    %c0_185 = arith.constant 0 : index
    %127 = vector.load %arg4[%c0_181, %c2_182, %c0_183, %c2_184, %c0_185] : memref<1x8x1x3x128xf32, #tpu.memory_space<vmem>>, vector<1x1x1x1x128xf32>
    %128 = vector.shape_cast %127 : vector<1x1x1x1x128xf32> to vector<1x128xf32>
    %129 = vector.broadcast %128 : vector<1x128xf32> to vector<4x128xf32>
    %130 = arith.mulf %126, %129 : vector<4x128xf32>
    %131 = arith.addf %124, %130 : vector<4x128xf32>
    %c0_186 = arith.constant 0 : index
    %c3_187 = arith.constant 3 : index
    %c0_188 = arith.constant 0 : index
    %c0_189 = arith.constant 0 : index
    %c0_190 = arith.constant 0 : index
    %132 = vector.load %arg3[%c0_186, %c3_187, %c0_188, %c0_189, %c0_190] : memref<1x8x1x4x128xf32, #tpu.memory_space<vmem>>, vector<1x1x1x4x128xf32>
    %133 = vector.shape_cast %132 : vector<1x1x1x4x128xf32> to vector<4x128xf32>
    %c0_191 = arith.constant 0 : index
    %c3_192 = arith.constant 3 : index
    %c0_193 = arith.constant 0 : index
    %c2_194 = arith.constant 2 : index
    %c0_195 = arith.constant 0 : index
    %134 = vector.load %arg4[%c0_191, %c3_192, %c0_193, %c2_194, %c0_195] : memref<1x8x1x3x128xf32, #tpu.memory_space<vmem>>, vector<1x1x1x1x128xf32>
    %135 = vector.shape_cast %134 : vector<1x1x1x1x128xf32> to vector<1x128xf32>
    %136 = vector.broadcast %135 : vector<1x128xf32> to vector<4x128xf32>
    %137 = arith.mulf %133, %136 : vector<4x128xf32>
    %138 = arith.addf %131, %137 : vector<4x128xf32>
    %c0_196 = arith.constant 0 : index
    %c4_197 = arith.constant 4 : index
    %c0_198 = arith.constant 0 : index
    %c0_199 = arith.constant 0 : index
    %c0_200 = arith.constant 0 : index
    %139 = vector.load %arg3[%c0_196, %c4_197, %c0_198, %c0_199, %c0_200] : memref<1x8x1x4x128xf32, #tpu.memory_space<vmem>>, vector<1x1x1x4x128xf32>
    %140 = vector.shape_cast %139 : vector<1x1x1x4x128xf32> to vector<4x128xf32>
    %c0_201 = arith.constant 0 : index
    %c4_202 = arith.constant 4 : index
    %c0_203 = arith.constant 0 : index
    %c2_204 = arith.constant 2 : index
    %c0_205 = arith.constant 0 : index
    %141 = vector.load %arg4[%c0_201, %c4_202, %c0_203, %c2_204, %c0_205] : memref<1x8x1x3x128xf32, #tpu.memory_space<vmem>>, vector<1x1x1x1x128xf32>
    %142 = vector.shape_cast %141 : vector<1x1x1x1x128xf32> to vector<1x128xf32>
    %143 = vector.broadcast %142 : vector<1x128xf32> to vector<4x128xf32>
    %144 = arith.mulf %140, %143 : vector<4x128xf32>
    %145 = arith.addf %138, %144 : vector<4x128xf32>
    %c0_206 = arith.constant 0 : index
    %c5_207 = arith.constant 5 : index
    %c0_208 = arith.constant 0 : index
    %c0_209 = arith.constant 0 : index
    %c0_210 = arith.constant 0 : index
    %146 = vector.load %arg3[%c0_206, %c5_207, %c0_208, %c0_209, %c0_210] : memref<1x8x1x4x128xf32, #tpu.memory_space<vmem>>, vector<1x1x1x4x128xf32>
    %147 = vector.shape_cast %146 : vector<1x1x1x4x128xf32> to vector<4x128xf32>
    %c0_211 = arith.constant 0 : index
    %c5_212 = arith.constant 5 : index
    %c0_213 = arith.constant 0 : index
    %c2_214 = arith.constant 2 : index
    %c0_215 = arith.constant 0 : index
    %148 = vector.load %arg4[%c0_211, %c5_212, %c0_213, %c2_214, %c0_215] : memref<1x8x1x3x128xf32, #tpu.memory_space<vmem>>, vector<1x1x1x1x128xf32>
    %149 = vector.shape_cast %148 : vector<1x1x1x1x128xf32> to vector<1x128xf32>
    %150 = vector.broadcast %149 : vector<1x128xf32> to vector<4x128xf32>
    %151 = arith.mulf %147, %150 : vector<4x128xf32>
    %152 = arith.addf %145, %151 : vector<4x128xf32>
    %c0_216 = arith.constant 0 : index
    %c6_217 = arith.constant 6 : index
    %c0_218 = arith.constant 0 : index
    %c0_219 = arith.constant 0 : index
    %c0_220 = arith.constant 0 : index
    %153 = vector.load %arg3[%c0_216, %c6_217, %c0_218, %c0_219, %c0_220] : memref<1x8x1x4x128xf32, #tpu.memory_space<vmem>>, vector<1x1x1x4x128xf32>
    %154 = vector.shape_cast %153 : vector<1x1x1x4x128xf32> to vector<4x128xf32>
    %c0_221 = arith.constant 0 : index
    %c6_222 = arith.constant 6 : index
    %c0_223 = arith.constant 0 : index
    %c2_224 = arith.constant 2 : index
    %c0_225 = arith.constant 0 : index
    %155 = vector.load %arg4[%c0_221, %c6_222, %c0_223, %c2_224, %c0_225] : memref<1x8x1x3x128xf32, #tpu.memory_space<vmem>>, vector<1x1x1x1x128xf32>
    %156 = vector.shape_cast %155 : vector<1x1x1x1x128xf32> to vector<1x128xf32>
    %157 = vector.broadcast %156 : vector<1x128xf32> to vector<4x128xf32>
    %158 = arith.mulf %154, %157 : vector<4x128xf32>
    %159 = arith.addf %152, %158 : vector<4x128xf32>
    %c0_226 = arith.constant 0 : index
    %c7_227 = arith.constant 7 : index
    %c0_228 = arith.constant 0 : index
    %c0_229 = arith.constant 0 : index
    %c0_230 = arith.constant 0 : index
    %160 = vector.load %arg3[%c0_226, %c7_227, %c0_228, %c0_229, %c0_230] : memref<1x8x1x4x128xf32, #tpu.memory_space<vmem>>, vector<1x1x1x4x128xf32>
    %161 = vector.shape_cast %160 : vector<1x1x1x4x128xf32> to vector<4x128xf32>
    %c0_231 = arith.constant 0 : index
    %c7_232 = arith.constant 7 : index
    %c0_233 = arith.constant 0 : index
    %c2_234 = arith.constant 2 : index
    %c0_235 = arith.constant 0 : index
    %162 = vector.load %arg4[%c0_231, %c7_232, %c0_233, %c2_234, %c0_235] : memref<1x8x1x3x128xf32, #tpu.memory_space<vmem>>, vector<1x1x1x1x128xf32>
    %163 = vector.shape_cast %162 : vector<1x1x1x1x128xf32> to vector<1x128xf32>
    %164 = vector.broadcast %163 : vector<1x128xf32> to vector<4x128xf32>
    %165 = arith.mulf %161, %164 : vector<4x128xf32>
    %166 = arith.addf %159, %165 : vector<4x128xf32>
    %c8 = arith.constant 8 : index
    %c0_236 = arith.constant 0 : index
    %167 = vector.load %arg8[%c8, %c0_236] : memref<12x128xf32, #tpu.memory_space<vmem>>, vector<4x128xf32>
    tpu.vector_store %arg8[%c8, %c0_236], %166 {strides = array<i32>} : memref<12x128xf32, #tpu.memory_space<vmem>>, vector<4x128xf32>,
    %c0_237 = arith.constant 0 : index
    %c0_238 = arith.constant 0 : index
    %168 = vector.load %arg5[%c0_237, %c0_238] : memref<8x12xf32, #tpu.memory_space<vmem>>, vector<8x12xf32>
    %c0_239 = arith.constant 0 : index
    %c0_240 = arith.constant 0 : index
    %169 = vector.load %arg8[%c0_239, %c0_240] : memref<12x128xf32, #tpu.memory_space<vmem>>, vector<12x128xf32>
    %cst = arith.constant dense<0.000000e+00> : vector<8x128xf32>
    %170 = tpu.matmul %168, %169, %cst {dimension_numbers = #tpu.dot_dimension_numbers<[1], [0], [0], [1], [0, 0, 1, 1], [], []>} : vector<8x12xf32>, vector<12x128xf32>, vector<8x128xf32> -> vector<8x128xf32>
    %c0_241 = arith.constant 0 : index
    %c0_242 = arith.constant 0 : index
    %c0_243 = arith.constant 0 : index
    %c0_244 = arith.constant 0 : index
    %171 = vector.load %arg6[%c0_241, %c0_242, %c0_243, %c0_244] : memref<1x1x8x128xf32, #tpu.memory_space<vmem>>, vector<1x1x8x128xf32>
    %172 = vector.shape_cast %171 : vector<1x1x8x128xf32> to vector<8x128xf32>
    %173 = vector.shape_cast %170 : vector<8x128xf32> to vector<1x1x8x128xf32>
    tpu.vector_store %arg6[%c0_241, %c0_242, %c0_243, %c0_244], %173 {strides = array<i32>} : memref<1x1x8x128xf32, #tpu.memory_space<vmem>>, vector<1x1x8x128xf32>,
    %c0_i32 = arith.constant 0 : i32
    %174 = arith.cmpi eq, %arg2, %c0_i32 : i32
    %175 = arith.extui %174 : i1 to i32
    %c0_i32_245 = arith.constant 0 : i32
    %176 = arith.cmpi ne, %175, %c0_i32_245 : i32
    scf.if %176 {
      %cst_256 = arith.constant 0.000000e+00 : f32
      %189 = vector.broadcast %cst_256 : f32 to vector<8x2xf32>
      %c0_257 = arith.constant 0 : index
      %c0_258 = arith.constant 0 : index
      %c0_259 = arith.constant 0 : index
      %c0_260 = arith.constant 0 : index
      %190 = vector.load %arg7[%c0_257, %c0_258, %c0_259, %c0_260] : memref<1x1x8x2xf32, #tpu.memory_space<vmem>>, vector<1x1x8x2xf32>
      %191 = vector.shape_cast %190 : vector<1x1x8x2xf32> to vector<8x2xf32>
      %192 = vector.shape_cast %189 : vector<8x2xf32> to vector<1x1x8x2xf32>
      tpu.vector_store %arg7[%c0_257, %c0_258, %c0_259, %c0_260], %192 {strides = array<i32>} : memref<1x1x8x2xf32, #tpu.memory_space<vmem>>, vector<1x1x8x2xf32>,
    } else {
    }
    %c0_246 = arith.constant 0 : index
    %c0_247 = arith.constant 0 : index
    %c0_248 = arith.constant 0 : index
    %c0_249 = arith.constant 0 : index
    %177 = vector.load %arg7[%c0_246, %c0_247, %c0_248, %c0_249] : memref<1x1x8x2xf32, #tpu.memory_space<vmem>>, vector<1x1x8x2xf32>
    %178 = vector.shape_cast %177 : vector<1x1x8x2xf32> to vector<8x2xf32>
    %cst_250 = arith.constant dense<0.000000e+00> : vector<8xf32>
    %179 = vector.multi_reduction <add>, %170, %cst_250 [1] : vector<8x128xf32> to vector<8xf32>
    %180 = vector.shape_cast %179 : vector<8xf32> to vector<8x1xf32>
    %181 = arith.mulf %170, %170 : vector<8x128xf32>
    %cst_251 = arith.constant dense<0.000000e+00> : vector<8xf32>
    %182 = vector.multi_reduction <add>, %181, %cst_251 [1] : vector<8x128xf32> to vector<8xf32>
    %183 = vector.shape_cast %182 : vector<8xf32> to vector<8x1xf32>
    %184 = tpu.concatenate %180, %183 in 1 : vector<8x1xf32>, vector<8x1xf32> -> vector<8x2xf32>
    %185 = arith.addf %178, %184 : vector<8x2xf32>
    %c0_252 = arith.constant 0 : index
    %c0_253 = arith.constant 0 : index
    %c0_254 = arith.constant 0 : index
    %c0_255 = arith.constant 0 : index
    %186 = vector.load %arg7[%c0_252, %c0_253, %c0_254, %c0_255] : memref<1x1x8x2xf32, #tpu.memory_space<vmem>>, vector<1x1x8x2xf32>
    %187 = vector.shape_cast %186 : vector<1x1x8x2xf32> to vector<8x2xf32>
    %188 = vector.shape_cast %185 : vector<8x2xf32> to vector<1x1x8x2xf32>
    tpu.vector_store %arg7[%c0_252, %c0_253, %c0_254, %c0_255], %188 {strides = array<i32>} : memref<1x1x8x2xf32, #tpu.memory_space<vmem>>, vector<1x1x8x2xf32>,
    return
  }
  func.func @transform_0(%arg0: i32, %arg1: i32, %arg2: i32) -> (i32, i32, i32, i32, i32) {
    %c0_i32 = arith.constant 0 : i32
    %c0_i32_0 = arith.constant 0 : i32
    %c0_i32_1 = arith.constant 0 : i32
    return %arg0, %c0_i32, %arg1, %c0_i32_0, %arg2 : i32, i32, i32, i32, i32
  }
  func.func @transform_1(%arg0: i32, %arg1: i32, %arg2: i32) -> (i32, i32, i32, i32, i32) {
    %c0_i32 = arith.constant 0 : i32
    %c0_i32_0 = arith.constant 0 : i32
    %c0_i32_1 = arith.constant 0 : i32
    return %arg0, %c0_i32, %arg1, %c0_i32_0, %arg2 : i32, i32, i32, i32, i32
  }
  func.func @transform_2(%arg0: i32, %arg1: i32, %arg2: i32) -> (i32, i32) {
    %c0_i32 = arith.constant 0 : i32
    %c0_i32_0 = arith.constant 0 : i32
    %c0_i32_1 = arith.constant 0 : i32
    return %c0_i32, %c0_i32_0 : i32, i32
  }
  func.func @transform_3(%arg0: i32, %arg1: i32, %arg2: i32) -> (i32, i32, i32, i32) {
    %c0_i32 = arith.constant 0 : i32
    %c0_i32_0 = arith.constant 0 : i32
    return %arg0, %arg1, %c0_i32, %arg2 : i32, i32, i32, i32
  }
  func.func @transform_4(%arg0: i32, %arg1: i32, %arg2: i32) -> (i32, i32, i32, i32) {
    %c0_i32 = arith.constant 0 : i32
    %c0_i32_0 = arith.constant 0 : i32
    %c0_i32_1 = arith.constant 0 : i32
    return %arg0, %arg1, %c0_i32, %c0_i32_0 : i32, i32, i32, i32
  }
}

module attributes {stable_mosaic.version = 11 : i64} {
  func.func @_intra_kernel(%arg0: i32, %arg1: i32, %arg2: memref<4x3xi32, #tpu.memory_space<smem>>, %arg3: memref<1x4x8x128xf32, #tpu.memory_space<vmem>>, %arg4: memref<1x8x2xf32, #tpu.memory_space<vmem>>, %arg5: memref<1x4x4x128xf32, #tpu.memory_space<vmem>>, %arg6: memref<8x24xf32, #tpu.memory_space<vmem>>, %arg7: memref<8x4xf32, #tpu.memory_space<vmem>>, %arg8: memref<8x1xf32, #tpu.memory_space<vmem>>, %arg9: memref<1x4x8x128xf32, #tpu.memory_space<vmem>>, %arg10: memref<1x1x8x2xf32, #tpu.memory_space<vmem>>, %arg11: memref<1x1x8x2xf32, #tpu.memory_space<vmem>>, %arg12: memref<4x8x128xf32, #tpu.memory_space<vmem>>) attributes {dimension_semantics = [#tpu.dimension_semantics<parallel>, #tpu.dimension_semantics<parallel>], iteration_bounds = array<i64: 2, 1>, scalar_prefetch = 1 : i64, scratch_operands = 1 : i64, tpu.core_type = #tpu.core_type<tc>, window_params = [{transform_indices = @transform_0, window_bounds = array<i64: 1, 4, 8, 128>}, {transform_indices = @transform_1, window_bounds = array<i64: 1, 8, 2>}, {transform_indices = @transform_2, window_bounds = array<i64: 1, 4, 4, 128>}, {pipeline_mode = #tpu.pipeline_mode<synchronous>, transform_indices = @transform_3, window_bounds = array<i64: 8, 24>}, {pipeline_mode = #tpu.pipeline_mode<synchronous>, transform_indices = @transform_4, window_bounds = array<i64: 8, 4>}, {pipeline_mode = #tpu.pipeline_mode<synchronous>, transform_indices = @transform_5, window_bounds = array<i64: 8, 1>}, {transform_indices = @transform_6, window_bounds = array<i64: 1, 4, 8, 128>}, {transform_indices = @transform_7, window_bounds = array<i64: 1, 1, 8, 2>}, {transform_indices = @transform_8, window_bounds = array<i64: 1, 1, 8, 2>}]} {
    %0 = tpu.iota {dimensions = array<i32: 1>} : vector<1x128xi32>
    %c128_i32 = arith.constant 128 : i32
    %1 = arith.muli %arg1, %c128_i32 : i32
    %2 = vector.broadcast %1 : i32 to vector<1x128xi32>
    %3 = arith.addi %0, %2 : vector<1x128xi32>
    %c16_i32 = arith.constant 16 : i32
    %4 = vector.broadcast %c16_i32 : i32 to vector<1x128xi32>
    %5 = arith.cmpi slt, %3, %4 : vector<1x128xi32>
    %6 = arith.extui %5 : vector<1x128xi1> to vector<1x128xi32>
    %7 = arith.sitofp %6 : vector<1x128xi32> to vector<1x128xf32>
    %c0 = arith.constant 0 : index
    %c0_0 = arith.constant 0 : index
    %c0_1 = arith.constant 0 : index
    %8 = vector.load %arg4[%c0, %c0_0, %c0_1] : memref<1x8x2xf32, #tpu.memory_space<vmem>>, vector<1x8x1xf32>
    %9 = vector.shape_cast %8 : vector<1x8x1xf32> to vector<8x1xf32>
    %c0_2 = arith.constant 0 : index
    %c0_3 = arith.constant 0 : index
    %c1 = arith.constant 1 : index
    %10 = vector.load %arg4[%c0_2, %c0_3, %c1] : memref<1x8x2xf32, #tpu.memory_space<vmem>>, vector<1x8x1xf32>
    %11 = vector.shape_cast %10 : vector<1x8x1xf32> to vector<8x1xf32>
    %c0_i32 = arith.constant 0 : i32
    %c4_i32 = arith.constant 4 : i32
    %12 = arith.addi %c0_i32, %c4_i32 : i32
    %c1_i32 = arith.constant 1 : i32
    scf.for %arg13 = %c0_i32 to %12 step %c1_i32  : i32 {
      %c0_25 = arith.constant 0 : index
      %29 = arith.index_cast %arg13 : i32 to index
      %c0_26 = arith.constant 0 : index
      %c0_27 = arith.constant 0 : index
      %30 = vector.load %arg3[%c0_25, %29, %c0_26, %c0_27] : memref<1x4x8x128xf32, #tpu.memory_space<vmem>>, vector<1x1x8x128xf32>
      %31 = vector.shape_cast %30 : vector<1x1x8x128xf32> to vector<8x128xf32>
      %32 = vector.broadcast %9 : vector<8x1xf32> to vector<8x128xf32>
      %33 = arith.mulf %31, %32 : vector<8x128xf32>
      %34 = vector.broadcast %11 : vector<8x1xf32> to vector<8x128xf32>
      %35 = arith.addf %33, %34 : vector<8x128xf32>
      %cst_28 = arith.constant 0.000000e+00 : f32
      %36 = vector.broadcast %cst_28 : f32 to vector<8x128xf32>
      %37 = arith.maximumf %35, %36 : vector<8x128xf32>
      %38 = vector.broadcast %7 : vector<1x128xf32> to vector<8x128xf32>
      %39 = arith.mulf %37, %38 : vector<8x128xf32>
      %40 = arith.index_cast %arg13 : i32 to index
      %c0_29 = arith.constant 0 : index
      %c0_30 = arith.constant 0 : index
      %41 = vector.load %arg12[%40, %c0_29, %c0_30] : memref<4x8x128xf32, #tpu.memory_space<vmem>>, vector<1x8x128xf32>
      %42 = vector.shape_cast %41 : vector<1x8x128xf32> to vector<8x128xf32>
      %43 = vector.shape_cast %39 : vector<8x128xf32> to vector<1x8x128xf32>
      tpu.vector_store %arg12[%40, %c0_29, %c0_30], %43 {strides = array<i32>} : memref<4x8x128xf32, #tpu.memory_space<vmem>>, vector<1x8x128xf32>,
    }
    %c4_i32_4 = arith.constant 4 : i32
    %c0_5 = arith.constant 0 : index
    %c0_6 = arith.constant 0 : index
    %13 = vector.load %arg6[%c0_5, %c0_6] : memref<8x24xf32, #tpu.memory_space<vmem>>, vector<8x8xf32>
    %c0_7 = arith.constant 0 : index
    %c8 = arith.constant 8 : index
    %14 = vector.load %arg6[%c0_7, %c8] : memref<8x24xf32, #tpu.memory_space<vmem>>, vector<8x8xf32>
    %c0_8 = arith.constant 0 : index
    %c16 = arith.constant 16 : index
    %15 = vector.load %arg6[%c0_8, %c16] : memref<8x24xf32, #tpu.memory_space<vmem>>, vector<8x8xf32>
    %c0_9 = arith.constant 0 : index
    %c0_10 = arith.constant 0 : index
    %16 = vector.load %arg7[%c0_9, %c0_10] : memref<8x4xf32, #tpu.memory_space<vmem>>, vector<8x4xf32>
    %c0_11 = arith.constant 0 : index
    %c0_12 = arith.constant 0 : index
    %17 = vector.load %arg8[%c0_11, %c0_12] : memref<8x1xf32, #tpu.memory_space<vmem>>, vector<8x1xf32>
    %cst = arith.constant 0.000000e+00 : f32
    %18 = vector.broadcast %cst : f32 to vector<8x1xf32>
    %c0_i32_13 = arith.constant 0 : i32
    %c4_i32_14 = arith.constant 4 : i32
    %19 = arith.addi %c0_i32_13, %c4_i32_14 : i32
    %c1_i32_15 = arith.constant 1 : i32
    %20:4 = scf.for %arg13 = %c0_i32_13 to %19 step %c1_i32_15 iter_args(%arg14 = %18, %arg15 = %18, %arg16 = %18, %arg17 = %18) -> (vector<8x1xf32>, vector<8x1xf32>, vector<8x1xf32>, vector<8x1xf32>)  : i32 {
      %29 = arith.index_cast %arg13 : i32 to index
      %c0_25 = arith.constant 0 : index
      %30 = memref.load %arg2[%29, %c0_25] : memref<4x3xi32, #tpu.memory_space<smem>>
      %31 = arith.index_cast %30 : i32 to index
      %c0_26 = arith.constant 0 : index
      %c0_27 = arith.constant 0 : index
      %32 = vector.load %arg12[%31, %c0_26, %c0_27] : memref<4x8x128xf32, #tpu.memory_space<vmem>>, vector<1x8x128xf32>
      %33 = vector.shape_cast %32 : vector<1x8x128xf32> to vector<8x128xf32>
      %cst_28 = arith.constant dense<0.000000e+00> : vector<8x128xf32>
      %34 = tpu.matmul %13, %33, %cst_28 {dimension_numbers = #tpu.dot_dimension_numbers<[1], [0], [0], [1], [0, 0, 1, 1], [], []>} : vector<8x8xf32>, vector<8x128xf32>, vector<8x128xf32> -> vector<8x128xf32>
      %35 = arith.index_cast %arg13 : i32 to index
      %c1_29 = arith.constant 1 : index
      %36 = memref.load %arg2[%35, %c1_29] : memref<4x3xi32, #tpu.memory_space<smem>>
      %37 = arith.index_cast %36 : i32 to index
      %c0_30 = arith.constant 0 : index
      %c0_31 = arith.constant 0 : index
      %38 = vector.load %arg12[%37, %c0_30, %c0_31] : memref<4x8x128xf32, #tpu.memory_space<vmem>>, vector<1x8x128xf32>
      %39 = vector.shape_cast %38 : vector<1x8x128xf32> to vector<8x128xf32>
      %cst_32 = arith.constant dense<0.000000e+00> : vector<8x128xf32>
      %40 = tpu.matmul %14, %39, %cst_32 {dimension_numbers = #tpu.dot_dimension_numbers<[1], [0], [0], [1], [0, 0, 1, 1], [], []>} : vector<8x8xf32>, vector<8x128xf32>, vector<8x128xf32> -> vector<8x128xf32>
      %41 = arith.addf %34, %40 : vector<8x128xf32>
      %42 = arith.index_cast %arg13 : i32 to index
      %c2 = arith.constant 2 : index
      %43 = memref.load %arg2[%42, %c2] : memref<4x3xi32, #tpu.memory_space<smem>>
      %44 = arith.index_cast %43 : i32 to index
      %c0_33 = arith.constant 0 : index
      %c0_34 = arith.constant 0 : index
      %45 = vector.load %arg12[%44, %c0_33, %c0_34] : memref<4x8x128xf32, #tpu.memory_space<vmem>>, vector<1x8x128xf32>
      %46 = vector.shape_cast %45 : vector<1x8x128xf32> to vector<8x128xf32>
      %cst_35 = arith.constant dense<0.000000e+00> : vector<8x128xf32>
      %47 = tpu.matmul %15, %46, %cst_35 {dimension_numbers = #tpu.dot_dimension_numbers<[1], [0], [0], [1], [0, 0, 1, 1], [], []>} : vector<8x8xf32>, vector<8x128xf32>, vector<8x128xf32> -> vector<8x128xf32>
      %48 = arith.addf %41, %47 : vector<8x128xf32>
      %c0_36 = arith.constant 0 : index
      %49 = arith.index_cast %arg13 : i32 to index
      %c0_37 = arith.constant 0 : index
      %c0_38 = arith.constant 0 : index
      %50 = vector.load %arg9[%c0_36, %49, %c0_37, %c0_38] : memref<1x4x8x128xf32, #tpu.memory_space<vmem>>, vector<1x1x8x128xf32>
      %51 = vector.shape_cast %50 : vector<1x1x8x128xf32> to vector<8x128xf32>
      %52 = vector.shape_cast %48 : vector<8x128xf32> to vector<1x1x8x128xf32>
      tpu.vector_store %arg9[%c0_36, %49, %c0_37, %c0_38], %52 {strides = array<i32>} : memref<1x4x8x128xf32, #tpu.memory_space<vmem>>, vector<1x1x8x128xf32>,
      %c0_39 = arith.constant 0 : index
      %53 = arith.index_cast %arg13 : i32 to index
      %c0_40 = arith.constant 0 : index
      %c0_41 = arith.constant 0 : index
      %54 = vector.load %arg5[%c0_39, %53, %c0_40, %c0_41] : memref<1x4x4x128xf32, #tpu.memory_space<vmem>>, vector<1x1x4x128xf32>
      %55 = vector.shape_cast %54 : vector<1x1x4x128xf32> to vector<4x128xf32>
      %cst_42 = arith.constant dense<0.000000e+00> : vector<8x128xf32>
      %56 = tpu.matmul %16, %55, %cst_42 {dimension_numbers = #tpu.dot_dimension_numbers<[1], [0], [0], [1], [0, 0, 1, 1], [], []>} : vector<8x4xf32>, vector<4x128xf32>, vector<8x128xf32> -> vector<8x128xf32>
      %57 = vector.broadcast %17 : vector<8x1xf32> to vector<8x128xf32>
      %58 = arith.addf %56, %57 : vector<8x128xf32>
      %59 = vector.broadcast %7 : vector<1x128xf32> to vector<8x128xf32>
      %60 = arith.mulf %58, %59 : vector<8x128xf32>
      %cst_43 = arith.constant dense<0.000000e+00> : vector<8xf32>
      %61 = vector.multi_reduction <add>, %48, %cst_43 [1] : vector<8x128xf32> to vector<8xf32>
      %62 = vector.shape_cast %61 : vector<8xf32> to vector<8x1xf32>
      %63 = arith.addf %arg14, %62 : vector<8x1xf32>
      %64 = arith.mulf %48, %48 : vector<8x128xf32>
      %cst_44 = arith.constant dense<0.000000e+00> : vector<8xf32>
      %65 = vector.multi_reduction <add>, %64, %cst_44 [1] : vector<8x128xf32> to vector<8xf32>
      %66 = vector.shape_cast %65 : vector<8xf32> to vector<8x1xf32>
      %67 = arith.addf %arg15, %66 : vector<8x1xf32>
      %cst_45 = arith.constant dense<0.000000e+00> : vector<8xf32>
      %68 = vector.multi_reduction <add>, %60, %cst_45 [1] : vector<8x128xf32> to vector<8xf32>
      %69 = vector.shape_cast %68 : vector<8xf32> to vector<8x1xf32>
      %70 = arith.addf %arg16, %69 : vector<8x1xf32>
      %71 = arith.mulf %60, %60 : vector<8x128xf32>
      %cst_46 = arith.constant dense<0.000000e+00> : vector<8xf32>
      %72 = vector.multi_reduction <add>, %71, %cst_46 [1] : vector<8x128xf32> to vector<8xf32>
      %73 = vector.shape_cast %72 : vector<8xf32> to vector<8x1xf32>
      %74 = arith.addf %arg17, %73 : vector<8x1xf32>
      scf.yield %63, %67, %70, %74 : vector<8x1xf32>, vector<8x1xf32>, vector<8x1xf32>, vector<8x1xf32>
    }
    %c4_i32_16 = arith.constant 4 : i32
    %21 = tpu.concatenate %20#0, %20#1 in 1 : vector<8x1xf32>, vector<8x1xf32> -> vector<8x2xf32>
    %c0_17 = arith.constant 0 : index
    %c0_18 = arith.constant 0 : index
    %c0_19 = arith.constant 0 : index
    %c0_20 = arith.constant 0 : index
    %22 = vector.load %arg10[%c0_17, %c0_18, %c0_19, %c0_20] : memref<1x1x8x2xf32, #tpu.memory_space<vmem>>, vector<1x1x8x2xf32>
    %23 = vector.shape_cast %22 : vector<1x1x8x2xf32> to vector<8x2xf32>
    %24 = vector.shape_cast %21 : vector<8x2xf32> to vector<1x1x8x2xf32>
    tpu.vector_store %arg10[%c0_17, %c0_18, %c0_19, %c0_20], %24 {strides = array<i32>} : memref<1x1x8x2xf32, #tpu.memory_space<vmem>>, vector<1x1x8x2xf32>,
    %25 = tpu.concatenate %20#2, %20#3 in 1 : vector<8x1xf32>, vector<8x1xf32> -> vector<8x2xf32>
    %c0_21 = arith.constant 0 : index
    %c0_22 = arith.constant 0 : index
    %c0_23 = arith.constant 0 : index
    %c0_24 = arith.constant 0 : index
    %26 = vector.load %arg11[%c0_21, %c0_22, %c0_23, %c0_24] : memref<1x1x8x2xf32, #tpu.memory_space<vmem>>, vector<1x1x8x2xf32>
    %27 = vector.shape_cast %26 : vector<1x1x8x2xf32> to vector<8x2xf32>
    %28 = vector.shape_cast %25 : vector<8x2xf32> to vector<1x1x8x2xf32>
    tpu.vector_store %arg11[%c0_21, %c0_22, %c0_23, %c0_24], %28 {strides = array<i32>} : memref<1x1x8x2xf32, #tpu.memory_space<vmem>>, vector<1x1x8x2xf32>,
    return
  }
  func.func @transform_0(%arg0: i32, %arg1: i32, %arg2: memref<4x3xi32, #tpu.memory_space<smem>>) -> (i32, i32, i32, i32) {
    %c0_i32 = arith.constant 0 : i32
    %c0_i32_0 = arith.constant 0 : i32
    %c0_i32_1 = arith.constant 0 : i32
    return %arg0, %c0_i32, %c0_i32_0, %arg1 : i32, i32, i32, i32
  }
  func.func @transform_1(%arg0: i32, %arg1: i32, %arg2: memref<4x3xi32, #tpu.memory_space<smem>>) -> (i32, i32, i32) {
    %c0_i32 = arith.constant 0 : i32
    %c0_i32_0 = arith.constant 0 : i32
    %c0_i32_1 = arith.constant 0 : i32
    return %arg0, %c0_i32, %c0_i32_0 : i32, i32, i32
  }
  func.func @transform_2(%arg0: i32, %arg1: i32, %arg2: memref<4x3xi32, #tpu.memory_space<smem>>) -> (i32, i32, i32, i32) {
    %c0_i32 = arith.constant 0 : i32
    %c0_i32_0 = arith.constant 0 : i32
    %c0_i32_1 = arith.constant 0 : i32
    return %arg0, %c0_i32, %c0_i32_0, %arg1 : i32, i32, i32, i32
  }
  func.func @transform_3(%arg0: i32, %arg1: i32, %arg2: memref<4x3xi32, #tpu.memory_space<smem>>) -> (i32, i32) {
    %c0_i32 = arith.constant 0 : i32
    %c0_i32_0 = arith.constant 0 : i32
    %c0_i32_1 = arith.constant 0 : i32
    return %c0_i32, %c0_i32_0 : i32, i32
  }
  func.func @transform_4(%arg0: i32, %arg1: i32, %arg2: memref<4x3xi32, #tpu.memory_space<smem>>) -> (i32, i32) {
    %c0_i32 = arith.constant 0 : i32
    %c0_i32_0 = arith.constant 0 : i32
    %c0_i32_1 = arith.constant 0 : i32
    return %c0_i32, %c0_i32_0 : i32, i32
  }
  func.func @transform_5(%arg0: i32, %arg1: i32, %arg2: memref<4x3xi32, #tpu.memory_space<smem>>) -> (i32, i32) {
    %c0_i32 = arith.constant 0 : i32
    %c0_i32_0 = arith.constant 0 : i32
    %c0_i32_1 = arith.constant 0 : i32
    return %c0_i32, %c0_i32_0 : i32, i32
  }
  func.func @transform_6(%arg0: i32, %arg1: i32, %arg2: memref<4x3xi32, #tpu.memory_space<smem>>) -> (i32, i32, i32, i32) {
    %c0_i32 = arith.constant 0 : i32
    %c0_i32_0 = arith.constant 0 : i32
    %c0_i32_1 = arith.constant 0 : i32
    return %arg0, %c0_i32, %c0_i32_0, %arg1 : i32, i32, i32, i32
  }
  func.func @transform_7(%arg0: i32, %arg1: i32, %arg2: memref<4x3xi32, #tpu.memory_space<smem>>) -> (i32, i32, i32, i32) {
    %c0_i32 = arith.constant 0 : i32
    %c0_i32_0 = arith.constant 0 : i32
    %c0_i32_1 = arith.constant 0 : i32
    return %arg0, %arg1, %c0_i32, %c0_i32_0 : i32, i32, i32, i32
  }
  func.func @transform_8(%arg0: i32, %arg1: i32, %arg2: memref<4x3xi32, #tpu.memory_space<smem>>) -> (i32, i32, i32, i32) {
    %c0_i32 = arith.constant 0 : i32
    %c0_i32_0 = arith.constant 0 : i32
    %c0_i32_1 = arith.constant 0 : i32
    return %arg0, %arg1, %c0_i32, %c0_i32_0 : i32, i32, i32, i32
  }
}

module attributes {stable_mosaic.version = 11 : i64} {
  func.func @_combine_kernel(%arg0: i32, %arg1: i32, %arg2: memref<1x4x8x128xf32, #tpu.memory_space<vmem>>, %arg3: memref<1x4x4x128xf32, #tpu.memory_space<vmem>>, %arg4: memref<8x4xf32, #tpu.memory_space<vmem>>, %arg5: memref<8x1xf32, #tpu.memory_space<vmem>>, %arg6: memref<1x8x2xf32, #tpu.memory_space<vmem>>, %arg7: memref<1x8x2xf32, #tpu.memory_space<vmem>>, %arg8: memref<1x4x8x128xf32, #tpu.memory_space<vmem>>) attributes {dimension_semantics = [#tpu.dimension_semantics<parallel>, #tpu.dimension_semantics<parallel>], iteration_bounds = array<i64: 2, 1>, scalar_prefetch = 0 : i64, scratch_operands = 0 : i64, tpu.core_type = #tpu.core_type<tc>, window_params = [{transform_indices = @transform_0, window_bounds = array<i64: 1, 4, 8, 128>}, {transform_indices = @transform_1, window_bounds = array<i64: 1, 4, 4, 128>}, {pipeline_mode = #tpu.pipeline_mode<synchronous>, transform_indices = @transform_2, window_bounds = array<i64: 8, 4>}, {pipeline_mode = #tpu.pipeline_mode<synchronous>, transform_indices = @transform_3, window_bounds = array<i64: 8, 1>}, {transform_indices = @transform_4, window_bounds = array<i64: 1, 8, 2>}, {transform_indices = @transform_5, window_bounds = array<i64: 1, 8, 2>}, {transform_indices = @transform_6, window_bounds = array<i64: 1, 4, 8, 128>}]} {
    %c0 = arith.constant 0 : index
    %c0_0 = arith.constant 0 : index
    %c0_1 = arith.constant 0 : index
    %0 = vector.load %arg6[%c0, %c0_0, %c0_1] : memref<1x8x2xf32, #tpu.memory_space<vmem>>, vector<1x8x1xf32>
    %1 = vector.shape_cast %0 : vector<1x8x1xf32> to vector<8x1xf32>
    %c0_2 = arith.constant 0 : index
    %c0_3 = arith.constant 0 : index
    %c1 = arith.constant 1 : index
    %2 = vector.load %arg6[%c0_2, %c0_3, %c1] : memref<1x8x2xf32, #tpu.memory_space<vmem>>, vector<1x8x1xf32>
    %3 = vector.shape_cast %2 : vector<1x8x1xf32> to vector<8x1xf32>
    %c0_4 = arith.constant 0 : index
    %c0_5 = arith.constant 0 : index
    %c0_6 = arith.constant 0 : index
    %4 = vector.load %arg7[%c0_4, %c0_5, %c0_6] : memref<1x8x2xf32, #tpu.memory_space<vmem>>, vector<1x8x1xf32>
    %5 = vector.shape_cast %4 : vector<1x8x1xf32> to vector<8x1xf32>
    %c0_7 = arith.constant 0 : index
    %c0_8 = arith.constant 0 : index
    %c1_9 = arith.constant 1 : index
    %6 = vector.load %arg7[%c0_7, %c0_8, %c1_9] : memref<1x8x2xf32, #tpu.memory_space<vmem>>, vector<1x8x1xf32>
    %7 = vector.shape_cast %6 : vector<1x8x1xf32> to vector<8x1xf32>
    %c0_10 = arith.constant 0 : index
    %c0_11 = arith.constant 0 : index
    %8 = vector.load %arg4[%c0_10, %c0_11] : memref<8x4xf32, #tpu.memory_space<vmem>>, vector<8x4xf32>
    %c0_12 = arith.constant 0 : index
    %c0_13 = arith.constant 0 : index
    %9 = vector.load %arg5[%c0_12, %c0_13] : memref<8x1xf32, #tpu.memory_space<vmem>>, vector<8x1xf32>
    %c0_i32 = arith.constant 0 : i32
    %c4_i32 = arith.constant 4 : i32
    %10 = arith.addi %c0_i32, %c4_i32 : i32
    %c1_i32 = arith.constant 1 : i32
    scf.for %arg9 = %c0_i32 to %10 step %c1_i32  : i32 {
      %c0_15 = arith.constant 0 : index
      %11 = arith.index_cast %arg9 : i32 to index
      %c0_16 = arith.constant 0 : index
      %c0_17 = arith.constant 0 : index
      %12 = vector.load %arg2[%c0_15, %11, %c0_16, %c0_17] : memref<1x4x8x128xf32, #tpu.memory_space<vmem>>, vector<1x1x8x128xf32>
      %13 = vector.shape_cast %12 : vector<1x1x8x128xf32> to vector<8x128xf32>
      %14 = vector.broadcast %1 : vector<8x1xf32> to vector<8x128xf32>
      %15 = arith.mulf %13, %14 : vector<8x128xf32>
      %16 = vector.broadcast %3 : vector<8x1xf32> to vector<8x128xf32>
      %17 = arith.addf %15, %16 : vector<8x128xf32>
      %cst = arith.constant 0.000000e+00 : f32
      %18 = vector.broadcast %cst : f32 to vector<8x128xf32>
      %19 = arith.maximumf %17, %18 : vector<8x128xf32>
      %c0_18 = arith.constant 0 : index
      %20 = arith.index_cast %arg9 : i32 to index
      %c0_19 = arith.constant 0 : index
      %c0_20 = arith.constant 0 : index
      %21 = vector.load %arg3[%c0_18, %20, %c0_19, %c0_20] : memref<1x4x4x128xf32, #tpu.memory_space<vmem>>, vector<1x1x4x128xf32>
      %22 = vector.shape_cast %21 : vector<1x1x4x128xf32> to vector<4x128xf32>
      %cst_21 = arith.constant dense<0.000000e+00> : vector<8x128xf32>
      %23 = tpu.matmul %8, %22, %cst_21 {dimension_numbers = #tpu.dot_dimension_numbers<[1], [0], [0], [1], [0, 0, 1, 1], [], []>} : vector<8x4xf32>, vector<4x128xf32>, vector<8x128xf32> -> vector<8x128xf32>
      %24 = vector.broadcast %9 : vector<8x1xf32> to vector<8x128xf32>
      %25 = arith.addf %23, %24 : vector<8x128xf32>
      %26 = vector.broadcast %5 : vector<8x1xf32> to vector<8x128xf32>
      %27 = arith.mulf %25, %26 : vector<8x128xf32>
      %28 = vector.broadcast %7 : vector<8x1xf32> to vector<8x128xf32>
      %29 = arith.addf %27, %28 : vector<8x128xf32>
      %cst_22 = arith.constant 0.000000e+00 : f32
      %30 = vector.broadcast %cst_22 : f32 to vector<8x128xf32>
      %31 = arith.maximumf %29, %30 : vector<8x128xf32>
      %32 = arith.addf %19, %31 : vector<8x128xf32>
      %c0_23 = arith.constant 0 : index
      %33 = arith.index_cast %arg9 : i32 to index
      %c0_24 = arith.constant 0 : index
      %c0_25 = arith.constant 0 : index
      %34 = vector.load %arg8[%c0_23, %33, %c0_24, %c0_25] : memref<1x4x8x128xf32, #tpu.memory_space<vmem>>, vector<1x1x8x128xf32>
      %35 = vector.shape_cast %34 : vector<1x1x8x128xf32> to vector<8x128xf32>
      %36 = vector.shape_cast %32 : vector<8x128xf32> to vector<1x1x8x128xf32>
      tpu.vector_store %arg8[%c0_23, %33, %c0_24, %c0_25], %36 {strides = array<i32>} : memref<1x4x8x128xf32, #tpu.memory_space<vmem>>, vector<1x1x8x128xf32>,
    }
    %c4_i32_14 = arith.constant 4 : i32
    return
  }
  func.func @transform_0(%arg0: i32, %arg1: i32) -> (i32, i32, i32, i32) {
    %c0_i32 = arith.constant 0 : i32
    %c0_i32_0 = arith.constant 0 : i32
    %c0_i32_1 = arith.constant 0 : i32
    return %arg0, %c0_i32, %c0_i32_0, %arg1 : i32, i32, i32, i32
  }
  func.func @transform_1(%arg0: i32, %arg1: i32) -> (i32, i32, i32, i32) {
    %c0_i32 = arith.constant 0 : i32
    %c0_i32_0 = arith.constant 0 : i32
    %c0_i32_1 = arith.constant 0 : i32
    return %arg0, %c0_i32, %c0_i32_0, %arg1 : i32, i32, i32, i32
  }
  func.func @transform_2(%arg0: i32, %arg1: i32) -> (i32, i32) {
    %c0_i32 = arith.constant 0 : i32
    %c0_i32_0 = arith.constant 0 : i32
    %c0_i32_1 = arith.constant 0 : i32
    return %c0_i32, %c0_i32_0 : i32, i32
  }
  func.func @transform_3(%arg0: i32, %arg1: i32) -> (i32, i32) {
    %c0_i32 = arith.constant 0 : i32
    %c0_i32_0 = arith.constant 0 : i32
    %c0_i32_1 = arith.constant 0 : i32
    return %c0_i32, %c0_i32_0 : i32, i32
  }
  func.func @transform_4(%arg0: i32, %arg1: i32) -> (i32, i32, i32) {
    %c0_i32 = arith.constant 0 : i32
    %c0_i32_0 = arith.constant 0 : i32
    %c0_i32_1 = arith.constant 0 : i32
    return %arg0, %c0_i32, %c0_i32_0 : i32, i32, i32
  }
  func.func @transform_5(%arg0: i32, %arg1: i32) -> (i32, i32, i32) {
    %c0_i32 = arith.constant 0 : i32
    %c0_i32_0 = arith.constant 0 : i32
    %c0_i32_1 = arith.constant 0 : i32
    return %arg0, %c0_i32, %c0_i32_0 : i32, i32, i32
  }
  func.func @transform_6(%arg0: i32, %arg1: i32) -> (i32, i32, i32, i32) {
    %c0_i32 = arith.constant 0 : i32
    %c0_i32_0 = arith.constant 0 : i32
    %c0_i32_1 = arith.constant 0 : i32
    return %arg0, %c0_i32, %c0_i32_0, %arg1 : i32, i32, i32, i32
  }
}

</mosaic_0001>

<bundles_post_ra>
// kernel: separable_so3_conv_block.3
= control target key start
LH: loop header
LB: loop body
LE: loop exit
PB: predicated region body
PF: predicated region fallthrough
CT: control target
= control target key end

     0   :  { %s1143_s15 = smov 0   ;;  %s1145_s16 = smov 0   ;;  %s1310_s0 = inlined_call_operand.vmem [shape: f32[2,8,4,4,128], index: 0, kind: input, shape index: {}]   ;;  %s1311_s1 = inlined_call_operand.vmem [shape: f32[2,8,4,3,128], index: 1, kind: input, shape index: {}]   ;;  %s1312_s2 = inlined_call_operand.vmem [shape: f32[8,12], index: 2, kind: input, shape index: {}]   ;;  %s1313_s3 = inlined_call_operand.vmem [shape: f32[2,4,8,128], index: 3, kind: output, shape index: {0}]   ;;  %s1314_s4 = inlined_call_operand.vmem [shape: f32[2,4,8,2], index: 4, kind: output, shape index: {1}]  }
   0x1   :  { %s1147_s17 = smov 0   ;;  %s1149_s18 = smov 0  }
   0x2   :  { %s1151_s19 = smov 0   ;;  %s1153_s20 = smov 0  }
   0x3   :  { %s1155_s21 = smov 0  }
   0x4 LB: > { %s30_s22 = sadd.s32 1, %s1106_s19  ;;  %s34_s23 = sadd.s32 1, %s1110_s20  ;;  %s1114_s21 = sphi %s1155_s21, %s15_s21   ;;  %s1110_s20 = sphi %s1153_s20, %s1321_s20   ;;  %s1106_s19 = sphi %s1151_s19, %s1320_s19   ;;  %s1102_s18 = sphi %s1149_s18, %s1319_s18   ;;  %s1098_s17 = sphi %s1147_s17, %s1318_s17   ;;  %s1094_s16 = sphi %s1145_s16, %s1317_s16   ;;  %s1090_s15 = sphi %s1143_s15, %s1316_s15  }
   0x5   : > { %p32_p0 = scmp.ge.s32.totalorder %s30_s22, 4  ;;  %p52_p1 = scmp.ne.s32.totalorder %s1094_s16, %s1090_s15 }
   0x6   : > { %p53_p2 = scmp.eq.s32.totalorder %s1114_s21, 0  ;;  %s45_s28 = sadd.s32 1, %s1094_s16 }
   0x7   : > { %s1323_s22 = smov (%p32_p0, %s30_s22), 0  ;;  %s1325_s23 = smov (!%p32_p0, %s34_s23), %s1110_s20 }
   0x8   : > { %p1186_p3 = por %p53_p2, %p52_p1  ;;  %p36_p4 = scmp.ge.s32.totalorder %s1325_s23, 2 }
   0x9   : > { %s39_s25 = ssub.s32 %s1106_s19, %s1323_s22  ;;  %p908_p6 = scmp.ge.s32.totalorder %s1114_s21, 8 }
   0xa   : > { %s1327_s23 = smov (%p36_p4, %s1325_s23), 0 }
   0xb   : > { %s38_s26 = ssub.s32 %s1110_s20, %s1327_s23  ;;  %190 = sbr.rel (%p908_p6) target bundleno = 38 (0x26), region = 20 }
   0xc   : > { %s40_s27 = sor.u32 %s39_s25, %s38_s26 }
   0xd   : > { %p43_p5 = scmp.eq.s32.totalorder %s40_s27, 0 }
   0xf   : > { %s1198_s29 = scalar_select %p43_p5, %s1094_s16, %s45_s28  }
  0x10   : > { %193 = sbr.rel (!%p1186_p3) target bundleno = 27 (0x1b), region = 24  ;;  %s195_s30 = sand.u32 (%p1186_p3), 1, %s1094_s16  }
  0x11   : > { %s910_s5 = sshll.u32 (%p1186_p3), %s1110_s20, 5  ;;  %s909_s6 = sshll.u32 (%p1186_p3), %s195_s30, 5 }
  0x12   : > { %s200_s7 = sadd.s32 (%p1186_p3), %s1106_s19, %s910_s5  ;;  %s197_s12 = scalar_lea.vmem (%p1186_p3), [#allocation3], %s909_s6 }
  0x13   : > { %s911_s8 = sshll.u32 (%p1186_p3), %s200_s7, 2 }
  0x14   : > { %s202_s11 = scalar_lea.vmem (%p1186_p3), %s1310_s0, %s911_s8 }
  0x15   : > { %v219_v0 = vld [vmem:[%s202_s11] sm:$0xf]  ;;  %v221_v1 = vld [vmem:[%s202_s11 + $0x10] sm:$0xf] }
  0x16   : > { %v223_v2 = vld [vmem:[%s202_s11 + $0x20] sm:$0xf]  ;;  %220 = vst [vmem:[%s197_s12] sm:$0xf] %v219_v0  ;;  %222 = vst [vmem:[%s197_s12 + $0x4] sm:$0xf] %v221_v1 }
  0x17   : > { %224 = vst [vmem:[%s197_s12 + $0x8] sm:$0xf] %v223_v2  ;;  %v225_v3 = vld [vmem:[%s202_s11 + $0x30] sm:$0xf]  ;;  %v227_v4 = vld [vmem:[%s202_s11 + $0x40] sm:$0xf] }
  0x18   : > { %v229_v5 = vld [vmem:[%s202_s11 + $0x50] sm:$0xf]  ;;  %226 = vst [vmem:[%s197_s12 + $0xc] sm:$0xf] %v225_v3  ;;  %228 = vst [vmem:[%s197_s12 + $0x10] sm:$0xf] %v227_v4 }
  0x19   : > { %230 = vst [vmem:[%s197_s12 + $0x14] sm:$0xf] %v229_v5  ;;  %v231_v6 = vld [vmem:[%s202_s11 + $0x60] sm:$0xf]  ;;  %v233_v7 = vld [vmem:[%s202_s11 + $0x70] sm:$0xf] }
  0x1a   : > { %232 = vst [vmem:[%s197_s12 + $0x18] sm:$0xf] %v231_v6  ;;  %234 = vst [vmem:[%s197_s12 + $0x1c] sm:$0xf] %v233_v7 }
  0x1b PF: > { %274 = sbr.rel (!%p1186_p3) target bundleno = 38 (0x26), region = 65  ;;  %s276_s13 = sand.u32 (%p1186_p3), 1, %s1094_s16  }
  0x1c   : > { %s913_s14 = sshll.u32 (%p1186_p3), %s1110_s20, 5  ;;  %s912_s25 = sshll.u32 (%p1186_p3), %s276_s13, 5 }
  0x1d   : > { %s281_s26 = sadd.s32 (%p1186_p3), %s1106_s19, %s913_s14  ;;  %s278_s6 = scalar_lea.vmem (%p1186_p3), [#allocation4], %s912_s25 }
  0x1e   : > { %s914_s27 = sshll.u32 (%p1186_p3), %s281_s26, 2 }
  0x1f   : > { %s283_s5 = scalar_lea.vmem (%p1186_p3), %s1311_s1, %s914_s27 }
  0x20   : > { %v300_v8 = vld [vmem:[%s283_s5] sm:$0xf]  ;;  %v302_v9 = vld [vmem:[%s283_s5 + $0x10] sm:$0xf] }
  0x21   : > { %v304_v10 = vld [vmem:[%s283_s5 + $0x20] sm:$0xf]  ;;  %301 = vst [vmem:[%s278_s6] sm:$0xf] %v300_v8  ;;  %303 = vst [vmem:[%s278_s6 + $0x4] sm:$0xf] %v302_v9 }
  0x22   : > { %305 = vst [vmem:[%s278_s6 + $0x8] sm:$0xf] %v304_v10  ;;  %v306_v11 = vld [vmem:[%s283_s5 + $0x30] sm:$0xf]  ;;  %v308_v12 = vld [vmem:[%s283_s5 + $0x40] sm:$0xf] }
  0x23   : > { %v310_v13 = vld [vmem:[%s283_s5 + $0x50] sm:$0xf]  ;;  %307 = vst [vmem:[%s278_s6 + $0xc] sm:$0xf] %v306_v11  ;;  %309 = vst [vmem:[%s278_s6 + $0x10] sm:$0xf] %v308_v12 }
  0x24   : > { %311 = vst [vmem:[%s278_s6 + $0x14] sm:$0xf] %v310_v13  ;;  %v312_v14 = vld [vmem:[%s283_s5 + $0x60] sm:$0xf]  ;;  %v314_v15 = vld [vmem:[%s283_s5 + $0x70] sm:$0xf] }
  0x25   : > { %313 = vst [vmem:[%s278_s6 + $0x18] sm:$0xf] %v312_v14  ;;  %315 = vst [vmem:[%s278_s6 + $0x1c] sm:$0xf] %v314_v15 }
  0x26 PF: > { %p915_p7 = scmp.ge.s32.totalorder %s1114_s21, 1  ;;  %p354_p8 = scmp.lt.s32.totalorder %s1114_s21, 9 }
  0x28   : > { %p355_p9 = pnand %p915_p7, %p354_p8 }
  0x29   : > { %s361_s24 = sand.u32 (!%p355_p9), 1, %s1090_s15   ;;  %p411_p10 = scmp.lt.s32.totalorder (!%p355_p9), %s1102_s18, 1 }
  0x2a   : > { %358 = sbr.rel (%p355_p9) target bundleno = 423 (0x1a7), region = 106  ;;  %s916_s7 = sshll.u32 (!%p355_p9), %s361_s24, 5 }
  0x2b   : > { %s1222_s8 = scalar_lea.vmem (!%p355_p9), [#allocation3], %s916_s7  ;;  %s1225_s9 = scalar_lea.vmem (!%p355_p9), [#allocation4], %s916_s7 }
  0x2c   : > { %p413_p11 = scmp.lt.s32.totalorder (!%p355_p9), %s1098_s17, 3 }
  0x2f   : > { %v1116_v16 = vmov 0.0   ;;  %vm1117_vm0 = vmmov 0   ;;  %v572_v17 = vld [vmem:[%s1222_s8] sm:$0xf]  ;;  %v967_v19 = vld [vmem:[%s1222_s8 + $0x4] sm:$0xf] }
  0x30   : > { %995 = vmatprep.subr.mxu0 %v1116_v16  ;;  %999 = vmatprep.mubr.msk.f32.mxu0 %vm1117_vm0, %v1116_v16  ;;  %v966_v18 = vld [vmem:[%s1225_s9 + $0x2] ss:$0 sm:$0xff]  ;;  %v969_v21 = vld [vmem:[%s1225_s9 + $0x6] ss:$0 sm:$0xff]  ;;  %v970_v22 = vld [vmem:[%s1222_s8 + $0x8] sm:$0xf] }
  0x31   : > { %v578_v20 = vmul.f32 %v966_v18, %v572_v17  ;;  %v972_v23 = vld [vmem:[%s1225_s9 + $0xa] ss:$0 sm:$0xff]  ;;  %v585_v24 = vmul.f32 %v969_v21, %v967_v19  ;;  %v973_v26 = vld [vmem:[%s1222_s8 + $0xc] sm:$0xf]  ;;  %v976_v28 = vld [vmem:[%s1222_s8 + $0x10] sm:$0xf] }
  0x32   : > { %v593_v25 = vmul.f32 %v972_v23, %v970_v22  ;;  %v975_v27 = vld [vmem:[%s1225_s9 + $0xe] ss:$0 sm:$0xff]  ;;  %v978_v29 = vld [vmem:[%s1225_s9 + $0x12] ss:$0 sm:$0xff]  ;;  %v979_v32 = vld [vmem:[%s1222_s8 + $0x14] sm:$0xf] }
  0x33   : > { %v586_v30 = vadd.f32 %v585_v24, %v578_v20  ;;  %v601_v31 = vmul.f32 %v975_v27, %v973_v26  ;;  %v981_v33 = vld [vmem:[%s1225_s9 + $0x16] ss:$0 sm:$0xff]  ;;  %v982_v34 = vld [vmem:[%s1222_s8 + $0x18] sm:$0xf]  ;;  %v430_v36 = vld [vmem:[%s1222_s8] sm:$0xf]  ;;  %v609_v39 = vmul.f32 %v978_v29, %v976_v28 }
  0x34   : > { %v984_v35 = vld [vmem:[%s1225_s9 + $0x1a] ss:$0 sm:$0xff]  ;;  %v922_v37 = vld [vmem:[%s1225_s9] ss:$0 sm:$0xff]  ;;  %v923_v41 = vld [vmem:[%s1222_s8 + $0x4] sm:$0xf]  ;;  %v617_v49 = vmul.f32 %v981_v33, %v979_v32 }
  0x35   : > { %v594_v38 = vadd.f32 %v593_v25, %v586_v30  ;;  %v436_v40 = vmul.f32 %v922_v37, %v430_v36  ;;  %v925_v42 = vld [vmem:[%s1225_s9 + $0x4] ss:$0 sm:$0xff]  ;;  %v926_v43 = vld [vmem:[%s1222_s8 + $0x8] sm:$0xf]  ;;  %v929_v46 = vld [vmem:[%s1222_s8 + $0xc] sm:$0xf]  ;;  %v625_v60 = vmul.f32 %v984_v35, %v982_v34 }
  0x36   : > { %v445_v44 = vmul.f32 %v925_v42, %v923_v41  ;;  %v928_v45 = vld [vmem:[%s1225_s9 + $0x8] ss:$0 sm:$0xff]  ;;  %v931_v47 = vld [vmem:[%s1225_s9 + $0xc] ss:$0 sm:$0xff]  ;;  %v985_v50 = vld [vmem:[%s1222_s8 + $0x1c] sm:$0xf] }
  0x37   : > { %v602_v48 = vadd.f32 %v601_v31, %v594_v38  ;;  %v455_v51 = vmul.f32 %v928_v45, %v926_v43  ;;  %v932_v52 = vld [vmem:[%s1222_s8 + $0x10] sm:$0xf]  ;;  %v987_v54 = vld [vmem:[%s1225_s9 + $0x1e] ss:$0 sm:$0xff]  ;;  %v465_v56 = vmul.f32 %v931_v47, %v929_v46  ;;  %v935_v57 = vld [vmem:[%s1222_s8 + $0x14] sm:$0xf] }
  0x38   : > { %v934_v53 = vld [vmem:[%s1225_s9 + $0x10] ss:$0 sm:$0xff]  ;;  %v446_v55 = vadd.f32 %v445_v44, %v436_v40  ;;  %v937_v58 = vld [vmem:[%s1225_s9 + $0x14] ss:$0 sm:$0xff]  ;;  %v938_v61 = vld [vmem:[%s1222_s8 + $0x18] sm:$0xf]  ;;  %v633_v6 = vmul.f32 %v987_v54, %v985_v50 }
  0x39   : > { %v610_v59 = vadd.f32 %v609_v39, %v602_v48  ;;  %v940_v62 = vld [vmem:[%s1225_s9 + $0x18] ss:$0 sm:$0xff]  ;;  %v508_v63 = vld [vmem:[%s1222_s8] sm:$0xf]  ;;  %v475_v1 = vmul.f32 %v934_v53, %v932_v52  ;;  %v945_v3 = vld [vmem:[%s1222_s8 + $0x4] sm:$0xf]  ;;  %v485_v13 = vmul.f32 %v937_v58, %v935_v57 }
  0x3a   : > { %v456_v0 = vadd.f32 %v455_v51, %v446_v55  ;;  %v944_v2 = vld [vmem:[%s1225_s9 + $0x1] ss:$0 sm:$0xff]  ;;  %v947_v4 = vld [vmem:[%s1225_s9 + $0x5] ss:$0 sm:$0xff]  ;;  %v948_v9 = vld [vmem:[%s1222_s8 + $0x8] sm:$0xf]  ;;  %v495_v25 = vmul.f32 %v940_v62, %v938_v61 }
  0x3b   : > { %v618_v5 = vadd.f32 %v617_v49, %v610_v59  ;;  %v514_v7 = vmul.f32 %v944_v2, %v508_v63  ;;  %v521_v8 = vmul.f32 %v947_v4, %v945_v3  ;;  %v950_v10 = vld [vmem:[%s1225_s9 + $0x9] ss:$0 sm:$0xff]  ;;  %v951_v11 = vld [vmem:[%s1222_s8 + $0xc] sm:$0xf]  ;;  %v954_v17 = vld [vmem:[%s1222_s8 + $0x10] sm:$0xf] }
  0x3c   : > { %v466_v12 = vadd.f32 %v465_v56, %v456_v0  ;;  %v529_v14 = vmul.f32 %v950_v10, %v948_v9  ;;  %v953_v15 = vld [vmem:[%s1225_s9 + $0xd] ss:$0 sm:$0xff]  ;;  %v956_v18 = vld [vmem:[%s1225_s9 + $0x11] ss:$0 sm:$0xff]  ;;  %v941_v20 = vld [vmem:[%s1222_s8 + $0x1c] sm:$0xf] }
  0x3d   : > { %v626_v19 = vadd.f32 %v625_v60, %v618_v5  ;;  %v943_v21 = vld [vmem:[%s1225_s9 + $0x1c] ss:$0 sm:$0xff]  ;;  %v522_v22 = vadd.f32 %v521_v8, %v514_v7  ;;  %v537_v23 = vmul.f32 %v953_v15, %v951_v11  ;;  %v957_v26 = vld [vmem:[%s1222_s8 + $0x14] sm:$0xf]  ;;  %v545_v30 = vmul.f32 %v956_v18, %v954_v17  ;;  %v960_v33 = vld [vmem:[%s1222_s8 + $0x18] sm:$0xf] }
  0x3e   : > { %v476_v24 = vadd.f32 %v475_v1, %v466_v12  ;;  %v959_v27 = vld [vmem:[%s1225_s9 + $0x15] ss:$0 sm:$0xff]  ;;  %v505_v32 = vmul.f32 %v943_v21, %v941_v20  ;;  %v962_v34 = vld [vmem:[%s1225_s9 + $0x19] ss:$0 sm:$0xff]  ;;  %v963_v38 = vld [vmem:[%s1222_s8 + $0x1c] sm:$0xf] }
  0x3f   : > { %v634_v28 = vadd.f32 %v633_v6, %v626_v19  ;;  %v530_v29 = vadd.f32 %v529_v14, %v522_v22  ;;  %v553_v36 = vmul.f32 %v959_v27, %v957_v26  ;;  %v965_v39 = vld [vmem:[%s1225_s9 + $0x1d] ss:$0 sm:$0xff]  ;;  %v561_v41 = vmul.f32 %v962_v34, %v960_v33  ;;  %v636_v48 = vld [vmem:[%s1312_s2] sm:$0xff]  ;;  %s1329_s18 = smov (!%p411_p10, %s1102_s18), 1  ;;  %s1331_s17 = smov (!%p413_p11, %s1098_s17), 3 }
  0x40   : > { %v486_v31 = vadd.f32 %v485_v13, %v476_v24  ;;  %v569_v44 = vmul.f32 %v965_v39, %v963_v38  ;;  %vm643_vm1 = vcmask 1043456   ;;  %vm639_vm2 = vcmask 97280   ;;  %s918_s11 = sshll.u32 %s1329_s18, 2 }
  0x41   : > { %635 = vst [vmem:[#allocation2 + $0x8] sm:$0xf] %v634_v28  ;;  %v538_v35 = vadd.f32 %v537_v23, %v530_v29  ;;  %s419_s12 = sadd.s32 %s918_s11, %s1331_s17  ;;  %vm722_vm3 = vcmask 15360   ;;  %vm730_vm4 = vcmask 7168  }
  0x42   : > { %v496_v37 = vadd.f32 %v495_v25, %v486_v31  ;;  %s919_s13 = sshll.u32 %s419_s12, 3 }
  0x43   : > { %v546_v40 = vadd.f32 %v545_v30, %v538_v35  ;;  %s421_s26 = scalar_lea.vmem %s1313_s3, %s919_s13  ;;  %s429_s30 = scalar_lea.vmem %s1314_s4, %s919_s13 }
  0x44   : > { %v506_v42 = vadd.f32 %v505_v32, %v496_v37  ;;  %723 = vst.msk [vmem:[%s429_s30] sm:$0xff] %vm722_vm3, %v1116_v16 }
  0x45   : > { %v554_v43 = vadd.f32 %v553_v36, %v546_v40 }
  0x46   : > { %507 = vst [vmem:[#allocation2] sm:$0xf] %v506_v42 }
  0x47   : > { %v562_v45 = vadd.f32 %v561_v41, %v554_v43 }
  0x48   : > { %v638_v46 = vld [vmem:[#allocation2 + $0x8] sm:$0xf] }
  0x49   : > { %996 = vmatpush3.msk.msra.mxu0 %vm643_vm1, %v638_v46  ;;  %v570_v47 = vadd.f32 %v569_v44, %v562_v45 }
  0x4a   : > { %997 = vmatprep.subr.mxu0 %v1116_v16 }
  0x4b   : > { %571 = vst [vmem:[#allocation2 + $0x4] sm:$0xf] %v570_v47  ;;  %v724_v54 = vld [vmem:[%s429_s30] sm:$0xff] }
  0x52   : > { %v637_v49 = vld [vmem:[#allocation2] sm:$0xff] }
  0x53   : > { %998 = vmatpush3.msra.mxu0 %v637_v49 }
  0x54   : > { %1000 = vmatmul.mubr.msk.f32.vlgmr.msra.gmra.mxu0 %vm639_vm2, %v636_v48 }
 0x114   : > { %v713_v50 = vpop.f32.mrf.mxu0 }
 0x115   : > { %717 = vst [vmem:[%s421_s26] sm:$0xff] %v713_v50  ;;  %725 = vadd.xlane.f32.xlu0 %v713_v50  ;;  %v727_v52 = vmul.f32 %v713_v50, %v713_v50 }
 0x116   : > { %v1001_v51 = vpop.f32.mrf.mxu0 }
 0x119   : > { %728 = vadd.xlane.f32.xlu0 %v727_v52 }
 0x19e   : > { %v726_v53 = vpop.xlane.xlu0 %725 }
 0x1a2   : > { %v729_v55 = vpop.xlane.xlu0 %728 }
 0x1a3   : > { %v731_v56 = vsel %vm730_vm4, %v726_v53, %v729_v55 }
 0x1a4   : > { %v732_v57 = vadd.f32 %v731_v56, %v724_v54 }
 0x1a6   : > { %734 = vst.msk [vmem:[%s429_s30] sm:$0xff] %vm722_vm3, %v732_v57 }
 0x1a7 PF: > { %s15_s21 = sadd.s32 1, %s1114_s21   ;;  %s1316_s15 = smov %s1094_s16 }
 0x1a8   : > { %p12_p12 = scmp.ge.s32.totalorder %s15_s21, 10   ;;  %s1317_s16 = smov %s1198_s29 }
 0x1a9   : > { %s1318_s17 = smov %s1106_s19  ;;  %s1319_s18 = smov %s1110_s20 }
 0x1aa   : > { %s1320_s19 = smov %s1323_s22  ;;  %s1321_s20 = smov %s1327_s23 }
 0x1ab   :  { %14 = sbr.rel (!%p12_p12) target bundleno = 4 (0x4), region = 187 }

// kernel: separable_so3_conv_block.5
= control target key start
LH: loop header
LB: loop body
LE: loop exit
PB: predicated region body
PF: predicated region fallthrough
CT: control target
= control target key end

     0   :  { %s750_s21 = smov 0   ;;  %s752_s22 = smov 0   ;;  %s817_s0 = inlined_call_operand.vmem [shape: f32[2,4,8,128], index: 0, kind: input, shape index: {}]   ;;  %s818_s1 = inlined_call_operand.vmem [shape: f32[2,4,4,128], index: 1, kind: input, shape index: {}]   ;;  %s819_s2 = inlined_call_operand.vmem [shape: f32[8,4], index: 2, kind: input, shape index: {}]   ;;  %s820_s3 = inlined_call_operand.vmem [shape: f32[8,1], index: 3, kind: input, shape index: {}]   ;;  %s821_s4 = inlined_call_operand.vmem [shape: f32[2,8,2], index: 4, kind: input, shape index: {}]   ;;  %s822_s5 = inlined_call_operand.vmem [shape: f32[2,8,2], index: 5, kind: input, shape index: {}]   ;;  %s823_s6 = inlined_call_operand.vmem [shape: f32[2,4,8,128], index: 6, kind: output, shape index: {}]  }
   0x1   :  { %s754_s23 = smov 0  }
   0x2 LB: > { %s28_s24 = sadd.s32 1, %s701_s22  ;;  %p614_p0 = scmp.ge.s32.totalorder %s705_s23, 1  ;;  %s705_s23 = sphi %s754_s23, %s16_s23   ;;  %s701_s22 = sphi %s752_s22, %s825_s22   ;;  %s697_s21 = sphi %s750_s21, %s824_s21  }
   0x3   : > { %p30_p1 = scmp.ge.s32.totalorder %s28_s24, 2  ;;  %p264_p2 = scmp.lt.s32.totalorder %s705_s23, 3 }
   0x5   : > { %s827_s24 = smov (%p30_p1, %s28_s24), 0  ;;  %p265_p3 = pnand %p614_p0, %p264_p2 }
   0x6   : > { %p316_p4 = scmp.lt.s32.totalorder (!%p265_p3), %s697_s21, 1  ;;  %s795_s27 = smov (!%p265_p3), 0  }
   0x7   : > { %268 = sbr.rel (%p265_p3) target bundleno = 228 (0xe4), region = 44 }
   0xc   : > { %v350_v0 = vld [vmem:[%s819_s2] sm:$0xff]  ;;  %s829_s21 = smov (!%p316_p4, %s697_s21), 1 }
   0xd   : > { %v351_v1 = vld [vmem:[%s820_s3] sm:$0xff]  ;;  %s629_s29 = sshll.u32 %s829_s21, 5  ;;  %s630_s30 = sshll.u32 %s829_s21, 4 }
   0xe   : > { %s777_s9 = scalar_lea.vmem %s817_s0, %s629_s29  ;;  %s782_s12 = scalar_lea.vmem %s818_s1, %s630_s30 }
   0xf   : > { %s619_s13 = sshll.u32 %s829_s21, 3  ;;  %s787_s16 = scalar_lea.vmem %s823_s6, %s629_s29 }
  0x10   : > { %s335_s19 = scalar_lea.vmem %s821_s4, %s619_s13  ;;  %s339_s26 = scalar_lea.vmem %s822_s5, %s619_s13 }
  0x11   : > { %v348_v2 = vld [vmem:[%s335_s19] sm:$0xff] }
  0x12   : > { %v349_v3 = vld [vmem:[%s339_s26] sm:$0xff] }
  0x13 LB: >> { %v711_v4 = vmov 0.0   ;;  %vm712_vm0 = vmmov 0   ;;  %s624_s21 = sshll.u32 %s709_s27, 2  ;;  %vm385_vm1 = vcmask 1043456   ;;  %v713_v5 = vmov 0   ;;  %s623_s29 = sshll.u32 %s709_s27, 3  ;;  %s709_s27 = sphi %s795_s27, %s357_s27  }
  0x14   : >> { %634 = vmatprep.subr.mxu0 %v711_v4  ;;  %636 = vmatprep.mubr.msk.f32.mxu0 %vm712_vm0, %v711_v4  ;;  %s374_s28 = scalar_lea.vmem %s782_s12, %s624_s21  ;;  %vm381_vm2 = vcmask 31744   ;;  %v714_v7 = vmov 1   ;;  %s359_s30 = scalar_lea.vmem %s777_s9, %s623_s29 }
  0x15   : >> { %675 = vset.pattern.permute.xlu0 %v713_v5  ;;  %676 = vset.pattern.permute.xlu1 %v713_v5  ;;  %v375_v6 = vld [vmem:[%s374_s28] sm:$0xf]  ;;  %s472_s7 = scalar_lea.vmem %s787_s16, %s623_s29  ;;  %s357_s27 = sadd.s32 1, %s709_s27  }
  0x16   : >> { %378 = vperm.xlu0 %675, %v351_v1   ;;  %461 = vperm.xlu1 %676, %v349_v3   ;;  %v360_v11 = vld [vmem:[%s359_s30] sm:$0xff]  ;;  %p354_p5 = scmp.ge.s32.totalorder %s357_s27, 4  }
  0x17   : >> { %635 = vmatpush3.msk.msra.mxu0 %vm385_vm1, %v375_v6 }
  0x18   : >> { %637 = vmatmul.mubr.msk.f32.vlgmr.msra.gmra.mxu0 %vm381_vm2, %v350_v0 }
  0x1a   : >> { %363 = vperm.xlu0 %675, %v348_v2   ;;  %677 = vset.pattern.permute.xlu1 %v714_v7 }
  0x1b   : >> { %368 = vperm.xlu1 %677, %v348_v2  }
  0x1e   : >> { %678 = vset.pattern.permute.xlu0 %v714_v7 }
  0x1f   : >> { %466 = vperm.xlu0 %678, %v349_v3  }
  0x91   : >> { %v379_v8 = vpop.permute.xlu0 %378  ;;  %v462_v9 = vpop.permute.xlu1 %461 }
  0x95   : >> { %v364_v10 = vpop.permute.xlu0 %363 }
  0x96   : >> { %v366_v12 = vmul.f32 %v364_v10, %v360_v11  ;;  %v369_v13 = vpop.permute.xlu1 %368 }
  0x98   : >> { %v371_v18 = vadd.f32 %v369_v13, %v366_v12 }
  0x9a   : >> { %v467_v17 = vpop.permute.xlu0 %466  ;;  %v372_v21 = vmax.f32 %v371_v18, 0.0 }
  0xd8   : >> { %v455_v14 = vpop.f32.mrf.mxu0 }
  0xd9   : >> { %v456_v15 = vadd.f32 %v455_v14, %v379_v8 }
  0xda   : >> { %v638_v16 = vpop.f32.mrf.mxu0 }
  0xdb   : >> { %v464_v19 = vmul.f32 %v462_v9, %v456_v15 }
  0xdd   : >> { %v469_v20 = vadd.f32 %v467_v17, %v464_v19 }
  0xdf   : >> { %v470_v22 = vmax.f32 %v469_v20, 0.0  ;;  %356 = sbr.rel (!%p354_p5) target bundleno = 19 (0x13), region = 93 }
  0xe1   : >> { %v471_v23 = vadd.f32 %v470_v22, %v372_v21 }
  0xe3   : >> { %473 = vst [vmem:[%s472_s7] sm:$0xff] %v471_v23 }
  0xe4 PF: > { %s16_s23 = sadd.s32 1, %s705_s23   ;;  %s824_s21 = smov %s701_s22 }
  0xe5   : > { %p13_p6 = scmp.ge.s32.totalorder %s16_s23, 4   ;;  %s825_s22 = smov %s827_s24 }
  0xe7   :  { %15 = sbr.rel (!%p13_p6) target bundleno = 2 (0x2), region = 104 }

// kernel: separable_so3_conv_block.4
= control target key start
LH: loop header
LB: loop body
LE: loop exit
PB: predicated region body
PF: predicated region fallthrough
CT: control target
= control target key end

     0   :  { %s1495_s0 = inlined_call_operand.vmem [shape: s32[4,3], index: 0, kind: input, shape index: {}]   ;;  %s1496_s1 = inlined_call_operand.vmem [shape: f32[2,4,8,128], index: 1, kind: input, shape index: {}]   ;;  %s1497_s2 = inlined_call_operand.vmem [shape: f32[2,8,2], index: 2, kind: input, shape index: {}]   ;;  %s1498_s3 = inlined_call_operand.vmem [shape: f32[2,4,4,128], index: 3, kind: input, shape index: {}]   ;;  %s1499_s4 = inlined_call_operand.vmem [shape: f32[8,24], index: 4, kind: input, shape index: {}]   ;;  %s1500_s5 = inlined_call_operand.vmem [shape: f32[8,4], index: 5, kind: input, shape index: {}]   ;;  %s1501_s6 = inlined_call_operand.vmem [shape: f32[8,1], index: 6, kind: input, shape index: {}]   ;;  %s1502_s7 = inlined_call_operand.vmem [shape: f32[2,4,8,128], index: 7, kind: output, shape index: {0}]   ;;  %s1503_s8 = inlined_call_operand.vmem [shape: f32[2,1,8,2], index: 8, kind: output, shape index: {1}]   ;;  %s1504_s9 = inlined_call_operand.vmem [shape: f32[2,1,8,2], index: 9, kind: output, shape index: {2}]  }
   0x1   :  { %s15_s11 = sshll.u32 %s1495_s0, 4  ;;  %s16_s11 = int_to_ptr.vmem [resolvable:$true] %s15_s11 }
   0x2   :  { %s1199_s12 = scalar_lea.vmem %s16_s11, 64  ;;  %p1204_p1 = scmp.lt.s32.totalorder %s16_s11, %s16_s11 }
   0x3   :  { %p1200_p0 = scmp.ne.s32.totalorder %s16_s11, %s1199_s12  ;;  %p1205_p2 = scmp.lt.s32.totalorder %s1199_s12, %s1199_s12 }
   0x5   :  { %p1206_p3 = por %p1205_p2, %p1204_p1 }
   0x7   :  { %p1207_p4 = pnand %p1206_p3, %p1200_p0 }
   0x9   :  { %1210 = shalt.err (!%p1207_p4)  }
   0xa   :  { %s1285_s13 = smov [#allocation4]  }
   0xb   :  { %18 = dma.vmem_to_smem %s16_s11, 64, %s1285_s13, [#allocation3] }
   0xc   :  { %1247 = dma.done.wait [#allocation3], 64 }
   0xd   :  { %1248 = vsyncadd [#allocation3], 4294967232 }
   0xe   :  { %20 = sfence }
   0xf   :  { %s1347_s14 = smov 0   ;;  %s1349_s15 = smov 0  }
  0x10   :  { %s1351_s16 = smov 0  }
  0x11 LB: > { %s38_s0 = sadd.s32 1, %s1255_s15  ;;  %p1058_p5 = scmp.ge.s32.totalorder %s1259_s16, 1  ;;  %s1259_s16 = sphi %s1351_s16, %s26_s16   ;;  %s1255_s15 = sphi %s1349_s15, %s1510_s15   ;;  %s1251_s14 = sphi %s1347_s14, %s1509_s14  }
  0x12   : > { %p40_p6 = scmp.ge.s32.totalorder %s38_s0, 2  ;;  %p321_p7 = scmp.lt.s32.totalorder %s1259_s16, 3 }
  0x14   : > { %s1512_s0 = smov (%p40_p6, %s38_s0), 0  ;;  %p322_p8 = pnand %p1058_p5, %p321_p7 }
  0x15   : > { %p387_p9 = scmp.lt.s32.totalorder (!%p322_p8), %s1251_s14, 1 }
  0x16   : > { %325 = sbr.rel (%p322_p8) target bundleno = 634 (0x27a), region = 44 }
  0x1b   : > { %v429_v0 = vlaneseq  ;;  %s1514_s14 = smov (!%p387_p9, %s1251_s14), 1  ;;  %v1286_v2 = vmov 0.0  }
  0x1c   : > { %s1083_s17 = sshll.u32 %s1514_s14, 5  ;;  %s1365_s18 = sshll.u32 %s1514_s14, 3 }
  0x1d   : > { %v430_v1 = vand.u32 127, %v429_v0  ;;  %s1370_s21 = scalar_lea.vmem %s1496_s1, %s1083_s17  ;;  %s398_s24 = scalar_lea.vmem %s1497_s2, %s1365_s18 }
  0x1e   : > { %s1084_s25 = sshll.u32 %s1514_s14, 4  ;;  %s1381_s28 = scalar_lea.vmem %s1502_s7, %s1083_s17  ;;  %v437_v4 = vld [vmem:[%s398_s24] sm:$0xff] }
  0x1f   : > { %vm434_vm0 = vcmp.lt.s32.totalorder %v430_v1, 16  ;;  %s1386_s10 = scalar_lea.vmem %s1498_s3, %s1084_s25  ;;  %s421_s13 = scalar_lea.vmem %s1503_s8, %s1365_s18 }
  0x20   : > { %v1376_v3 = vsel %vm434_vm0, 1.0, %v1286_v2  ;;  %s428_s22 = scalar_lea.vmem %s1504_s9, %s1365_s18  ;;  %s1261_s14 = smov 0  }
  0x21 LB: >> { %v1287_v5 = vmov 0   ;;  %v1288_v6 = vmov 1   ;;  %s1069_s17 = sshll.u32 %s1263_s14, 3  ;;  %s443_s14 = sadd.s32 1, %s1263_s14   ;;  %s1263_s14 = sphi %s1261_s14, %s443_s14  }
  0x22   : >> { %1195 = vset.pattern.permute.xlu0 %v1287_v5  ;;  %s445_s23 = scalar_lea.vmem %s1370_s21, %s1069_s17  ;;  %s460_s24 = scalar_lea.vmem [#allocation2], %s1069_s17 }
  0x23   : >> { %449 = vperm.xlu0 %1195, %v437_v4   ;;  %v446_v8 = vld [vmem:[%s445_s23] sm:$0xff]  ;;  %p440_p10 = scmp.ge.s32.totalorder %s443_s14, 4  }
  0x24   : > { %v1401_v14 = vld [vmem:[%s1499_s4] sm:$0xff] (%p440_p10)  ;;  %v1413_v17 = vmov (%p440_p10), 0.0   ;;  %v1415_v18 = vmov (%p440_p10), 0.0   ;;  %v1417_v19 = vmov (%p440_p10), 0.0   ;;  %v1419_v20 = vmov (%p440_p10), 0.0   ;;  %s1421_s21 = smov (%p440_p10), 0  }
  0x25   : > { %v1406_v15 = vld [vmem:[%s1500_s5] sm:$0xff] (%p440_p10) }
  0x26   : > { %v1411_v16 = vld [vmem:[%s1501_s6] sm:$0xff] (%p440_p10) }
  0x27   : >> { %1196 = vset.pattern.permute.xlu0 %v1288_v6 }
  0x28   : >> { %454 = vperm.xlu0 %1196, %v437_v4  }
  0x9e   : >> { %v450_v7 = vpop.permute.xlu0 %449 }
  0x9f   : >> { %v452_v9 = vmul.f32 %v450_v7, %v446_v8 }
  0xa3   : >> { %v455_v10 = vpop.permute.xlu0 %454 }
  0xa4   : >> { %v457_v11 = vadd.f32 %v455_v10, %v452_v9 }
  0xa6   : >> { %v458_v12 = vmax.f32 %v457_v11, 0.0  ;;  %442 = sbr.rel (!%p440_p10) target bundleno = 33 (0x21), region = 125 }
  0xa8   : >> { %v459_v13 = vmul.f32 %v1376_v3, %v458_v12 }
  0xaa   : >> { %461 = vst [vmem:[%s460_s24] sm:$0xff] %v459_v13 }
  0xab LB: >> { %s1289_s12 = smov 120   ;;  %v1290_v21 = vmov 0.0   ;;  %vm1291_vm1 = vmmov 0   ;;  %s1441_s19 = sshll.u32 %s1283_s21, 7  ;;  %v1292_v22 = vmov 0   ;;  %vm488_vm2 = vcmask 64512   ;;  %s1283_s21 = sphi %s1421_s21, %s470_s21   ;;  %v1279_v20 = vphi %v1419_v20, %v1508_v20   ;;  %v1275_v19 = vphi %v1417_v19, %v1507_v19   ;;  %v1271_v18 = vphi %v1415_v18, %v1506_v18   ;;  %v1267_v17 = vphi %v1413_v17, %v1505_v17  }
  0xac   : >> { %486 = vrot.lane.b32.xlu0 %v1401_v14, %s1289_s12  ;;  %1094 = vmatprep.subr.mxu0 %v1290_v21  ;;  %s480_s20 = sadd.s32 1, %s1441_s19  ;;  %s476_s14 = sld [smem:[#allocation4 + %s1441_s19]]  ;;  %vm728_vm3 = vcmask 1043456   ;;  %vm724_vm4 = vcmask 31744  }
  0xad   : >> { %1099 = vmatprep.subr.mxu1 %v1290_v21  ;;  %1096 = vmatprep.mubr.msk.f32.mxu0 %vm1291_vm1, %v1290_v21  ;;  %s1293_s17 = smov 112   ;;  %s481_s23 = sld [smem:[#allocation4 + %s480_s20]] }
  0xae   : >> { %1101 = vmatprep.mubr.msk.f32.mxu1 %vm1291_vm1, %v1290_v21  ;;  %1197 = vset.pattern.permute.xlu1 %v1292_v22  ;;  %s1078_s24 = sshll.u32 %s1283_s21, 2  ;;  %s633_s11 = sadd.s32 2, %s1441_s19 }
  0xaf   : >> { %721 = vperm.xlu1 %1197, %v1411_v16   ;;  %1198 = vset.pattern.permute.xlu0 %v1292_v22  ;;  %s717_s26 = scalar_lea.vmem %s1386_s10, %s1078_s24  ;;  %s634_s12 = sld [smem:[#allocation4 + %s633_s11]] }
  0xb0   : >> { %638 = vrot.lane.b32.xlu0 %v1401_v14, %s1293_s17  ;;  %v718_v25 = vld [vmem:[%s717_s26] sm:$0xf]  ;;  %s1077_s19 = sshll.u32 %s1283_s21, 3  ;;  %s470_s21 = sadd.s32 1, %s1283_s21  }
  0xb1   : >> { %s714_s17 = scalar_lea.vmem %s1381_s28, %s1077_s19  ;;  %p467_p11 = scmp.ge.s32.totalorder %s470_s21, 4  }
  0xb2   : >> { %s1071_s25 = sshll.u32 %s476_s14, 3  ;;  %vm817_vm5 = vcmask (%p467_p11), 7168   ;;  %vm819_vm6 = vcmask (%p467_p11), 15360  }
  0xb3   : >> { %s1072_s27 = sshll.u32 %s481_s23, 3  ;;  %s478_s29 = scalar_lea.vmem [#allocation2], %s1071_s25 }
  0xb4   : >> { %v479_v23 = vld [vmem:[%s478_s29] sm:$0xff]  ;;  %s483_s30 = scalar_lea.vmem [#allocation2], %s1072_s27 }
  0xb5   : >> { %v484_v24 = vld [vmem:[%s483_s30] sm:$0xff]  ;;  %1100 = vmatpush3.msra.mxu1 %v479_v23  ;;  %s1075_s20 = sshll.u32 %s634_s12, 3 }
  0xb6   : >> { %1095 = vmatpush3.msra.mxu0 %v484_v24  ;;  %1102 = vmatmul.mubr.msk.f32.vlgmr.msra.gmra.mxu1 %vm488_vm2, %v1401_v14  ;;  %s636_s14 = scalar_lea.vmem [#allocation2], %s1075_s20 }
  0xb7   : >> { %1104 = vmatprep.subr.mxu0 %v1290_v21  ;;  %1109 = vmatprep.subr.mxu1 %v1290_v21  ;;  %v637_v26 = vld [vmem:[%s636_s14] sm:$0xff] }
  0xb8   : >> { %1110 = vmatpush3.msk.msra.mxu1 %vm728_vm3, %v718_v25  ;;  %1111 = vmatprep.mubr.msk.f32.mxu1 %vm1291_vm1, %v1290_v21 }
  0xba   : >> { %1112 = vmatmul.mubr.msk.f32.vlgmr.msra.gmra.mxu1 %vm724_vm4, %v1406_v15 }
 0x11e   : >> { %v487_v27 = vpop.permute.xlu0 %486 }
 0x11f   : >> { %1097 = vmatmul.mubr.msk.f32.vlgmr.msra.gmra.mxu0 %vm488_vm2, %v487_v27 }
 0x120   : >> { %1105 = vmatpush3.msra.mxu0 %v637_v26  ;;  %1106 = vmatprep.mubr.msk.f32.mxu0 %vm1291_vm1, %v1290_v21 }
 0x122   : >> { %v639_v28 = vpop.permute.xlu0 %638 }
 0x123   : >> { %1107 = vmatmul.mubr.msk.f32.vlgmr.msra.gmra.mxu0 %vm488_vm2, %v639_v28 }
 0x12a   : >> { %v722_v33 = vpop.permute.xlu1 %721 }
 0x176   : >> { %v629_v29 = vpop.f32.mrf.mxu1 }
 0x178   : >> { %v1103_v30 = vpop.f32.mrf.mxu1 }
 0x17a   : >> { %v798_v31 = vpop.f32.mrf.mxu1 }
 0x17b   : >> { %v799_v34 = vadd.f32 %v798_v31, %v722_v33 }
 0x17c   : >> { %v1113_v32 = vpop.f32.mrf.mxu1 }
 0x17d   : >> { %v802_v38 = vmul.f32 %v1376_v3, %v799_v34 }
 0x17f   : >> { %v813_v43 = vmul.f32 %v802_v38, %v802_v38 }
 0x1df   : >> { %v557_v35 = vpop.f32.mrf.mxu0 }
 0x1e0   : >> { %v630_v37 = vadd.f32 %v629_v29, %v557_v35 }
 0x1e1   : >> { %v1098_v36 = vpop.f32.mrf.mxu0 }
 0x1e3   : >> { %v708_v39 = vpop.f32.mrf.mxu0 }
 0x1e4   : >> { %v712_v40 = vadd.f32 %v708_v39, %v630_v37 }
 0x1e5   : >> { %v1108_v41 = vpop.f32.mrf.mxu0 }
 0x1e6   : >> { %715 = vst [vmem:[%s714_s17] sm:$0xff] %v712_v40  ;;  %803 = vadd.xlane.f32.xlu1 %v712_v40  ;;  %v806_v42 = vmul.f32 %v712_v40, %v712_v40 }
 0x1e8   : >> { %807 = vadd.xlane.f32.xlu0 %v806_v42 }
 0x1ea   : >> { %814 = vadd.xlane.f32.xlu1 %v813_v43 }
 0x1ec   : >> { %810 = vadd.xlane.f32.xlu0 %v802_v38 }
 0x26f   : >> { %v804_v44 = vpop.xlane.xlu1 %803 }
 0x270   : >> { %v805_v45 = vadd.f32 %v1279_v20, %v804_v44  }
 0x271   : >> { %v808_v46 = vpop.xlane.xlu0 %807 }
 0x272   : >> { %v809_v47 = vadd.f32 %v1275_v19, %v808_v46   ;;  %v1508_v20 = vmov %v805_v45 }
 0x273   : >> { %v815_v48 = vpop.xlane.xlu1 %814 }
 0x274   : >> { %v816_v49 = vadd.f32 %v1267_v17, %v815_v48   ;;  %v1507_v19 = vmov %v809_v47  ;;  %469 = sbr.rel (!%p467_p11) target bundleno = 171 (0xab), region = 136  ;;  %v818_v52 = vsel (%p467_p11), %vm817_vm5, %v805_v45, %v809_v47 }
 0x275   : >> { %v811_v50 = vpop.xlane.xlu0 %810  ;;  %820 = vst.msk [vmem:[%s421_s13] sm:$0xff] (%p467_p11), %vm819_vm6, %v818_v52 }
 0x276   : >> { %v812_v51 = vadd.f32 %v1271_v18, %v811_v50   ;;  %v1505_v17 = vmov %v816_v49 }
 0x278   : >> { %v1506_v18 = vmov %v812_v51  ;;  %v821_v53 = vsel (%p467_p11), %vm817_vm5, %v812_v51, %v816_v49 }
 0x279   : > { %822 = vst.msk [vmem:[%s428_s22] sm:$0xff] %vm819_vm6, %v821_v53 }
 0x27a PF: > { %s26_s16 = sadd.s32 1, %s1259_s16   ;;  %s1509_s14 = smov %s1255_s15 }
 0x27b   : > { %p23_p12 = scmp.ge.s32.totalorder %s26_s16, 4   ;;  %s1510_s15 = smov %s1512_s0 }
 0x27d   :  { %25 = sbr.rel (!%p23_p12) target bundleno = 17 (0x11), region = 147 }

</bundles_post_ra>
